<compile_context>
chip_gen: v7x
topology: tpu7x:2x2x1
jax: 0.10.0
libtpu: 0.0.40
codegen_flags: <defaults>
</compile_context>

<pallas_src>
import numpy as np
import jax
import jax.numpy as jnp
from jax import lax
from jax.experimental import pallas as pl
from jax.experimental.pallas import tpu as pltpu


# ------------------------------ fused kernel -------------------------------

def _lenet_fused_kernel(x_ref, t1_ref, b1_ref, r1_ref, c1_ref,
                        t2_ref, b2_ref, r2_ref, c2_ref,
                        w3_ref, b3_ref, o_ref):
    """One image per grid step; everything stays in VMEM/vregs."""
    f32, bf16 = jnp.float32, jnp.bfloat16

    def mm(a, b):
        return jnp.dot(a, b, preferred_element_type=f32)

    xp = x_ref[0]                                            # (32, 32) f32, pre-padded

    # ---- conv1 (1->6, 5x5, pad=2 already applied) + bias + relu ----------
    acc1 = jnp.zeros((28, 6 * 28), f32)
    for ky in range(5):
        acc1 = acc1 + mm(xp[ky:ky + 28, :].astype(bf16), t1_ref[ky])   # (28,32)@(32,168)
    out1 = jnp.maximum(acc1 + b1_ref[...], 0.0)              # (28, 168), cols = co*28 + x

    # ---- pool1 (2x2/2) via selection matmuls + max -------------------------
    rmax1 = jnp.maximum(mm(r1_ref[0], out1), mm(r1_ref[1], out1))       # (14, 168)
    act1 = jnp.maximum(mm(rmax1, c1_ref[0]), mm(rmax1, c1_ref[1]))      # (14, 84) = (y, ci*14+x)

    # ---- conv2 (6->16, 5x5) + bias + relu ----------------------------------
    acc2 = jnp.zeros((10, 16 * 10), f32)
    for ky in range(5):
        acc2 = acc2 + mm(act1[ky:ky + 10, :].astype(bf16), t2_ref[ky])  # (10,84)@(84,160)
    out2 = jnp.maximum(acc2 + b2_ref[...], 0.0)              # (10, 160), cols = co*10 + x

    # ---- pool2 -------------------------------------------------------------
    rmax2 = jnp.maximum(mm(r2_ref[0], out2), mm(r2_ref[1], out2))       # (5, 160)
    act2 = jnp.maximum(mm(rmax2, c2_ref[0]), mm(rmax2, c2_ref[1]))      # (5, 80) = (i, co*5+j)

    # ---- conv3 (16->120, 5x5 on 5x5 map -> 1x1) + bias + relu --------------
    acc3 = jnp.zeros((1, 120), f32)
    for i in range(5):
        acc3 = acc3 + mm(act2[i:i + 1, :].astype(bf16), w3_ref[i])      # (1,80)@(80,120)
    o_ref[0] = jnp.maximum(acc3 + b3_ref[...], 0.0)          # (1, 120)


# ------------------------------ wrapper -------------------------------------

def truncated_lenet5(x_nchw, p):
    """Truncated LeNet-5 forward_to('flatten'): (N,1,28,28) -> (N,120)."""
    f32, bf16 = jnp.float32, jnp.bfloat16
    n = x_nchw.shape[0]

    # conv1 input, pre-padded to 32x32 (padding=2), channel squeezed.
    xp = jnp.pad(x_nchw[:, 0].astype(f32), ((0, 0), (2, 2), (2, 2)))   # (N,32,32)

    # ---- row-Toeplitz conv weight slabs (tiny, built once per call) --------
    def toeplitz(w, wi, wo):
        # w: (..., 5) taps; returns (..., wi, wo) with [..., c, x] = w[..., c-x]
        d = jnp.arange(wi)[:, None] - jnp.arange(wo)[None, :]
        valid = ((d >= 0) & (d < 5)).astype(w.dtype)
        return w[..., jnp.clip(d, 0, 4)] * valid

    # T1[ky, c, co*28+x] = w1[co, 0, ky, c-x]
    t1 = toeplitz(p["w1"][:, 0], 32, 28)                     # (6,5,32,28)
    t1 = t1.transpose(1, 2, 0, 3).reshape(5, 32, 6 * 28).astype(bf16)
    b1 = jnp.repeat(p["b1"], 28)[None, :].astype(f32)        # (1, 168)

    # T2[ky, ci*14+c, co*10+x] = w2[co, ci, ky, c-x]
    t2 = toeplitz(p["w2"], 14, 10)                           # (16,6,5,14,10)
    t2 = t2.transpose(2, 1, 3, 0, 4).reshape(5, 6 * 14, 16 * 10).astype(bf16)
    b2 = jnp.repeat(p["b2"], 10)[None, :].astype(f32)        # (1, 160)

    # W3r[i, co*5+j, o] = w3[o, co, i, j]
    w3 = p["w3"].transpose(2, 1, 3, 0).reshape(5, 16 * 5, 120).astype(bf16)
    b3 = p["b3"][None, :].astype(f32)                        # (1, 120)

    # ---- exact 0/1 selection matrices for the 2x2 max-pools -----------------
    def row_sel(no):                                         # (2, no, 2*no)
        y = jnp.arange(2 * no)[None, :]
        i = jnp.arange(no)[:, None]
        return jnp.stack([(y == 2 * i), (y == 2 * i + 1)]).astype(f32)

    def col_sel(nblk, win):                                  # (2, nblk*win, nblk*win//2)
        wo = win // 2
        q = jnp.arange(nblk * wo)
        src = win * (q // wo) + 2 * (q % wo)
        c = jnp.arange(nblk * win)[:, None]
        return jnp.stack([(c == src[None, :]), (c == src[None, :] + 1)]).astype(f32)

    r1, c1 = row_sel(14), col_sel(6, 28)
    r2, c2 = row_sel(5), col_sel(16, 10)

    zero3 = lambda i: (0, 0, 0)
    zero2 = lambda i: (0, 0)
    out = pl.pallas_call(
        _lenet_fused_kernel,
        out_shape=jax.ShapeDtypeStruct((n, 1, 120), f32),
        grid=(n,),
        in_specs=[
            pl.BlockSpec((1, 32, 32), lambda i: (i, 0, 0)),
            pl.BlockSpec(t1.shape, zero3), pl.BlockSpec(b1.shape, zero2),
            pl.BlockSpec(r1.shape, zero3), pl.BlockSpec(c1.shape, zero3),
            pl.BlockSpec(t2.shape, zero3), pl.BlockSpec(b2.shape, zero2),
            pl.BlockSpec(r2.shape, zero3), pl.BlockSpec(c2.shape, zero3),
            pl.BlockSpec(w3.shape, zero3), pl.BlockSpec(b3.shape, zero2),
        ],
        out_specs=pl.BlockSpec((1, 1, 120), lambda i: (i, 0, 0)),
        compiler_params=pltpu.CompilerParams(
            dimension_semantics=("parallel",)),
    )(xp, t1, b1, r1, c1, t2, b2, r2, c2, w3, b3)

    # flatten (spatial is 1x1); fc4 / relu4 / fc5 are nn.Identity -> no-ops.
    return out.reshape(n, 120)


# -------------------------- deterministic params ---------------------------

def init_params(key):
    """PyTorch-default-style init: U(-1/sqrt(fan_in), 1/sqrt(fan_in))."""
    def conv_init(k_, cout, cin, ksz):
        kw, kb = jax.random.split(k_)
        fan_in = cin * ksz * ksz
        bound = 1.0 / np.sqrt(fan_in)
        w = jax.random.uniform(kw, (cout, cin, ksz, ksz), jnp.float32,
                               -bound, bound)
        b = jax.random.uniform(kb, (cout,), jnp.float32, -bound, bound)
        return w, b

    k1, k2, k3 = jax.random.split(key, 3)
    w1, b1 = conv_init(k1, 6, 1, 5)
    w2, b2 = conv_init(k2, 16, 6, 5)
    w3, b3 = conv_init(k3, 120, 16, 5)
    return dict(w1=w1, b1=b1, w2=w2, b2=b2, w3=w3, b3=b3)


# ------------------------------ reference ----------------------------------

def reference_forward(x, p):
    def conv(xx, w, b, pad=0):
        out = lax.conv_general_dilated(
            xx, w, window_strides=(1, 1),
            padding=[(pad, pad), (pad, pad)],
            dimension_numbers=("NCHW", "OIHW", "NCHW"),
            precision=lax.Precision.HIGHEST)
        return jax.nn.relu(out + b[None, :, None, None])

    def pool(xx):
        return lax.reduce_window(xx, -jnp.inf, lax.max,
                                 (1, 1, 2, 2), (1, 1, 2, 2), "VALID")

    y = pool(conv(x, p["w1"], p["b1"], pad=2))
    y = pool(conv(y, p["w2"], p["b2"]))
    y = conv(y, p["w3"], p["b3"])
    return y.reshape(y.shape[0], -1)


if __name__ == "__main__":
    key = jax.random.PRNGKey(0)
    kx, kp = jax.random.split(key)
    x = jax.random.normal(kx, (2, 1, 28, 28), jnp.float32)   # NCHW MNIST-sized
    params = init_params(kp)

    out = jax.jit(truncated_lenet5)(x, params)
    out = jax.block_until_ready(out)
    assert out.shape == (2, 120) and out.dtype == jnp.float32

    ref = reference_forward(x, params)
    np.testing.assert_allclose(np.asarray(out), np.asarray(ref),
                               atol=2e-2, rtol=2e-2)
    print("KERNEL_OK")
</pallas_src>

<mosaic_0001>
module attributes {stable_mosaic.version = 11 : i64} {
  func.func @_lenet_fused_kernel(%arg0: i32, %arg1: memref<1x32x32xf32, #tpu.memory_space<vmem>>, %arg2: memref<5x32x168xbf16, #tpu.memory_space<vmem>>, %arg3: memref<1x168xf32, #tpu.memory_space<vmem>>, %arg4: memref<2x14x28xf32, #tpu.memory_space<vmem>>, %arg5: memref<2x168x84xf32, #tpu.memory_space<vmem>>, %arg6: memref<5x84x160xbf16, #tpu.memory_space<vmem>>, %arg7: memref<1x160xf32, #tpu.memory_space<vmem>>, %arg8: memref<2x5x10xf32, #tpu.memory_space<vmem>>, %arg9: memref<2x160x80xf32, #tpu.memory_space<vmem>>, %arg10: memref<5x80x120xbf16, #tpu.memory_space<vmem>>, %arg11: memref<1x120xf32, #tpu.memory_space<vmem>>, %arg12: memref<1x1x120xf32, #tpu.memory_space<vmem>>) attributes {dimension_semantics = [#tpu.dimension_semantics<parallel>], iteration_bounds = array<i64: 2>, scalar_prefetch = 0 : i64, scratch_operands = 0 : i64, tpu.core_type = #tpu.core_type<tc>, window_params = [{transform_indices = @transform_0, window_bounds = array<i64: 1, 32, 32>}, {pipeline_mode = #tpu.pipeline_mode<synchronous>, transform_indices = @transform_1, window_bounds = array<i64: 5, 32, 168>}, {pipeline_mode = #tpu.pipeline_mode<synchronous>, transform_indices = @transform_2, window_bounds = array<i64: 1, 168>}, {pipeline_mode = #tpu.pipeline_mode<synchronous>, transform_indices = @transform_3, window_bounds = array<i64: 2, 14, 28>}, {pipeline_mode = #tpu.pipeline_mode<synchronous>, transform_indices = @transform_4, window_bounds = array<i64: 2, 168, 84>}, {pipeline_mode = #tpu.pipeline_mode<synchronous>, transform_indices = @transform_5, window_bounds = array<i64: 5, 84, 160>}, {pipeline_mode = #tpu.pipeline_mode<synchronous>, transform_indices = @transform_6, window_bounds = array<i64: 1, 160>}, {pipeline_mode = #tpu.pipeline_mode<synchronous>, transform_indices = @transform_7, window_bounds = array<i64: 2, 5, 10>}, {pipeline_mode = #tpu.pipeline_mode<synchronous>, transform_indices = @transform_8, window_bounds = array<i64: 2, 160, 80>}, {pipeline_mode = #tpu.pipeline_mode<synchronous>, transform_indices = @transform_9, window_bounds = array<i64: 5, 80, 120>}, {pipeline_mode = #tpu.pipeline_mode<synchronous>, transform_indices = @transform_10, window_bounds = array<i64: 1, 120>}, {transform_indices = @transform_11, window_bounds = array<i64: 1, 1, 120>}]} {
    %c0 = arith.constant 0 : index
    %c0_0 = arith.constant 0 : index
    %c0_1 = arith.constant 0 : index
    %0 = vector.load %arg1[%c0, %c0_0, %c0_1] : memref<1x32x32xf32, #tpu.memory_space<vmem>>, vector<1x32x32xf32>
    %1 = vector.shape_cast %0 : vector<1x32x32xf32> to vector<32x32xf32>
    %cst = arith.constant 0.000000e+00 : f32
    %2 = vector.broadcast %cst : f32 to vector<28x168xf32>
    %3 = vector.extract_strided_slice %1 {offsets = [0, 0], sizes = [28, 32], strides = [1, 1]} : vector<32x32xf32> to vector<28x32xf32>
    %4 = arith.truncf %3 : vector<28x32xf32> to vector<28x32xbf16>
    %c0_2 = arith.constant 0 : index
    %c0_3 = arith.constant 0 : index
    %c0_4 = arith.constant 0 : index
    %5 = vector.load %arg2[%c0_2, %c0_3, %c0_4] : memref<5x32x168xbf16, #tpu.memory_space<vmem>>, vector<1x32x168xbf16>
    %6 = vector.shape_cast %5 : vector<1x32x168xbf16> to vector<32x168xbf16>
    %cst_5 = arith.constant dense<0.000000e+00> : vector<28x168xf32>
    %7 = tpu.matmul %4, %6, %cst_5 {dimension_numbers = #tpu.dot_dimension_numbers<[1], [0], [0], [1], [0, 0, 1, 1], [], []>} : vector<28x32xbf16>, vector<32x168xbf16>, vector<28x168xf32> -> vector<28x168xf32>
    %8 = arith.addf %2, %7 : vector<28x168xf32>
    %9 = vector.extract_strided_slice %1 {offsets = [1, 0], sizes = [28, 32], strides = [1, 1]} : vector<32x32xf32> to vector<28x32xf32>
    %10 = arith.truncf %9 : vector<28x32xf32> to vector<28x32xbf16>
    %c1 = arith.constant 1 : index
    %c0_6 = arith.constant 0 : index
    %c0_7 = arith.constant 0 : index
    %11 = vector.load %arg2[%c1, %c0_6, %c0_7] : memref<5x32x168xbf16, #tpu.memory_space<vmem>>, vector<1x32x168xbf16>
    %12 = vector.shape_cast %11 : vector<1x32x168xbf16> to vector<32x168xbf16>
    %cst_8 = arith.constant dense<0.000000e+00> : vector<28x168xf32>
    %13 = tpu.matmul %10, %12, %cst_8 {dimension_numbers = #tpu.dot_dimension_numbers<[1], [0], [0], [1], [0, 0, 1, 1], [], []>} : vector<28x32xbf16>, vector<32x168xbf16>, vector<28x168xf32> -> vector<28x168xf32>
    %14 = arith.addf %8, %13 : vector<28x168xf32>
    %15 = vector.extract_strided_slice %1 {offsets = [2, 0], sizes = [28, 32], strides = [1, 1]} : vector<32x32xf32> to vector<28x32xf32>
    %16 = arith.truncf %15 : vector<28x32xf32> to vector<28x32xbf16>
    %c2 = arith.constant 2 : index
    %c0_9 = arith.constant 0 : index
    %c0_10 = arith.constant 0 : index
    %17 = vector.load %arg2[%c2, %c0_9, %c0_10] : memref<5x32x168xbf16, #tpu.memory_space<vmem>>, vector<1x32x168xbf16>
    %18 = vector.shape_cast %17 : vector<1x32x168xbf16> to vector<32x168xbf16>
    %cst_11 = arith.constant dense<0.000000e+00> : vector<28x168xf32>
    %19 = tpu.matmul %16, %18, %cst_11 {dimension_numbers = #tpu.dot_dimension_numbers<[1], [0], [0], [1], [0, 0, 1, 1], [], []>} : vector<28x32xbf16>, vector<32x168xbf16>, vector<28x168xf32> -> vector<28x168xf32>
    %20 = arith.addf %14, %19 : vector<28x168xf32>
    %21 = vector.extract_strided_slice %1 {offsets = [3, 0], sizes = [28, 32], strides = [1, 1]} : vector<32x32xf32> to vector<28x32xf32>
    %22 = arith.truncf %21 : vector<28x32xf32> to vector<28x32xbf16>
    %c3 = arith.constant 3 : index
    %c0_12 = arith.constant 0 : index
    %c0_13 = arith.constant 0 : index
    %23 = vector.load %arg2[%c3, %c0_12, %c0_13] : memref<5x32x168xbf16, #tpu.memory_space<vmem>>, vector<1x32x168xbf16>
    %24 = vector.shape_cast %23 : vector<1x32x168xbf16> to vector<32x168xbf16>
    %cst_14 = arith.constant dense<0.000000e+00> : vector<28x168xf32>
    %25 = tpu.matmul %22, %24, %cst_14 {dimension_numbers = #tpu.dot_dimension_numbers<[1], [0], [0], [1], [0, 0, 1, 1], [], []>} : vector<28x32xbf16>, vector<32x168xbf16>, vector<28x168xf32> -> vector<28x168xf32>
    %26 = arith.addf %20, %25 : vector<28x168xf32>
    %27 = vector.extract_strided_slice %1 {offsets = [4, 0], sizes = [28, 32], strides = [1, 1]} : vector<32x32xf32> to vector<28x32xf32>
    %28 = arith.truncf %27 : vector<28x32xf32> to vector<28x32xbf16>
    %c4 = arith.constant 4 : index
    %c0_15 = arith.constant 0 : index
    %c0_16 = arith.constant 0 : index
    %29 = vector.load %arg2[%c4, %c0_15, %c0_16] : memref<5x32x168xbf16, #tpu.memory_space<vmem>>, vector<1x32x168xbf16>
    %30 = vector.shape_cast %29 : vector<1x32x168xbf16> to vector<32x168xbf16>
    %cst_17 = arith.constant dense<0.000000e+00> : vector<28x168xf32>
    %31 = tpu.matmul %28, %30, %cst_17 {dimension_numbers = #tpu.dot_dimension_numbers<[1], [0], [0], [1], [0, 0, 1, 1], [], []>} : vector<28x32xbf16>, vector<32x168xbf16>, vector<28x168xf32> -> vector<28x168xf32>
    %32 = arith.addf %26, %31 : vector<28x168xf32>
    %c0_18 = arith.constant 0 : index
    %c0_19 = arith.constant 0 : index
    %33 = vector.load %arg3[%c0_18, %c0_19] : memref<1x168xf32, #tpu.memory_space<vmem>>, vector<1x168xf32>
    %34 = vector.broadcast %33 : vector<1x168xf32> to vector<28x168xf32>
    %35 = arith.addf %32, %34 : vector<28x168xf32>
    %cst_20 = arith.constant 0.000000e+00 : f32
    %36 = vector.broadcast %cst_20 : f32 to vector<28x168xf32>
    %37 = arith.maximumf %35, %36 : vector<28x168xf32>
    %c0_21 = arith.constant 0 : index
    %c0_22 = arith.constant 0 : index
    %c0_23 = arith.constant 0 : index
    %38 = vector.load %arg4[%c0_21, %c0_22, %c0_23] : memref<2x14x28xf32, #tpu.memory_space<vmem>>, vector<1x14x28xf32>
    %39 = vector.shape_cast %38 : vector<1x14x28xf32> to vector<14x28xf32>
    %cst_24 = arith.constant dense<0.000000e+00> : vector<14x168xf32>
    %40 = tpu.matmul %39, %37, %cst_24 {dimension_numbers = #tpu.dot_dimension_numbers<[1], [0], [0], [1], [0, 0, 1, 1], [], []>} : vector<14x28xf32>, vector<28x168xf32>, vector<14x168xf32> -> vector<14x168xf32>
    %c1_25 = arith.constant 1 : index
    %c0_26 = arith.constant 0 : index
    %c0_27 = arith.constant 0 : index
    %41 = vector.load %arg4[%c1_25, %c0_26, %c0_27] : memref<2x14x28xf32, #tpu.memory_space<vmem>>, vector<1x14x28xf32>
    %42 = vector.shape_cast %41 : vector<1x14x28xf32> to vector<14x28xf32>
    %cst_28 = arith.constant dense<0.000000e+00> : vector<14x168xf32>
    %43 = tpu.matmul %42, %37, %cst_28 {dimension_numbers = #tpu.dot_dimension_numbers<[1], [0], [0], [1], [0, 0, 1, 1], [], []>} : vector<14x28xf32>, vector<28x168xf32>, vector<14x168xf32> -> vector<14x168xf32>
    %44 = arith.maximumf %40, %43 : vector<14x168xf32>
    %c0_29 = arith.constant 0 : index
    %c0_30 = arith.constant 0 : index
    %c0_31 = arith.constant 0 : index
    %45 = vector.load %arg5[%c0_29, %c0_30, %c0_31] : memref<2x168x84xf32, #tpu.memory_space<vmem>>, vector<1x168x84xf32>
    %46 = vector.shape_cast %45 : vector<1x168x84xf32> to vector<168x84xf32>
    %cst_32 = arith.constant dense<0.000000e+00> : vector<14x84xf32>
    %47 = tpu.matmul %44, %46, %cst_32 {dimension_numbers = #tpu.dot_dimension_numbers<[1], [0], [0], [1], [0, 0, 1, 1], [], []>} : vector<14x168xf32>, vector<168x84xf32>, vector<14x84xf32> -> vector<14x84xf32>
    %c1_33 = arith.constant 1 : index
    %c0_34 = arith.constant 0 : index
    %c0_35 = arith.constant 0 : index
    %48 = vector.load %arg5[%c1_33, %c0_34, %c0_35] : memref<2x168x84xf32, #tpu.memory_space<vmem>>, vector<1x168x84xf32>
    %49 = vector.shape_cast %48 : vector<1x168x84xf32> to vector<168x84xf32>
    %cst_36 = arith.constant dense<0.000000e+00> : vector<14x84xf32>
    %50 = tpu.matmul %44, %49, %cst_36 {dimension_numbers = #tpu.dot_dimension_numbers<[1], [0], [0], [1], [0, 0, 1, 1], [], []>} : vector<14x168xf32>, vector<168x84xf32>, vector<14x84xf32> -> vector<14x84xf32>
    %51 = arith.maximumf %47, %50 : vector<14x84xf32>
    %cst_37 = arith.constant 0.000000e+00 : f32
    %52 = vector.broadcast %cst_37 : f32 to vector<10x160xf32>
    %53 = vector.extract_strided_slice %51 {offsets = [0, 0], sizes = [10, 84], strides = [1, 1]} : vector<14x84xf32> to vector<10x84xf32>
    %54 = arith.truncf %53 : vector<10x84xf32> to vector<10x84xbf16>
    %c0_38 = arith.constant 0 : index
    %c0_39 = arith.constant 0 : index
    %c0_40 = arith.constant 0 : index
    %55 = vector.load %arg6[%c0_38, %c0_39, %c0_40] : memref<5x84x160xbf16, #tpu.memory_space<vmem>>, vector<1x84x160xbf16>
    %56 = vector.shape_cast %55 : vector<1x84x160xbf16> to vector<84x160xbf16>
    %cst_41 = arith.constant dense<0.000000e+00> : vector<10x160xf32>
    %57 = tpu.matmul %54, %56, %cst_41 {dimension_numbers = #tpu.dot_dimension_numbers<[1], [0], [0], [1], [0, 0, 1, 1], [], []>} : vector<10x84xbf16>, vector<84x160xbf16>, vector<10x160xf32> -> vector<10x160xf32>
    %58 = arith.addf %52, %57 : vector<10x160xf32>
    %59 = vector.extract_strided_slice %51 {offsets = [1, 0], sizes = [10, 84], strides = [1, 1]} : vector<14x84xf32> to vector<10x84xf32>
    %60 = arith.truncf %59 : vector<10x84xf32> to vector<10x84xbf16>
    %c1_42 = arith.constant 1 : index
    %c0_43 = arith.constant 0 : index
    %c0_44 = arith.constant 0 : index
    %61 = vector.load %arg6[%c1_42, %c0_43, %c0_44] : memref<5x84x160xbf16, #tpu.memory_space<vmem>>, vector<1x84x160xbf16>
    %62 = vector.shape_cast %61 : vector<1x84x160xbf16> to vector<84x160xbf16>
    %cst_45 = arith.constant dense<0.000000e+00> : vector<10x160xf32>
    %63 = tpu.matmul %60, %62, %cst_45 {dimension_numbers = #tpu.dot_dimension_numbers<[1], [0], [0], [1], [0, 0, 1, 1], [], []>} : vector<10x84xbf16>, vector<84x160xbf16>, vector<10x160xf32> -> vector<10x160xf32>
    %64 = arith.addf %58, %63 : vector<10x160xf32>
    %65 = vector.extract_strided_slice %51 {offsets = [2, 0], sizes = [10, 84], strides = [1, 1]} : vector<14x84xf32> to vector<10x84xf32>
    %66 = arith.truncf %65 : vector<10x84xf32> to vector<10x84xbf16>
    %c2_46 = arith.constant 2 : index
    %c0_47 = arith.constant 0 : index
    %c0_48 = arith.constant 0 : index
    %67 = vector.load %arg6[%c2_46, %c0_47, %c0_48] : memref<5x84x160xbf16, #tpu.memory_space<vmem>>, vector<1x84x160xbf16>
    %68 = vector.shape_cast %67 : vector<1x84x160xbf16> to vector<84x160xbf16>
    %cst_49 = arith.constant dense<0.000000e+00> : vector<10x160xf32>
    %69 = tpu.matmul %66, %68, %cst_49 {dimension_numbers = #tpu.dot_dimension_numbers<[1], [0], [0], [1], [0, 0, 1, 1], [], []>} : vector<10x84xbf16>, vector<84x160xbf16>, vector<10x160xf32> -> vector<10x160xf32>
    %70 = arith.addf %64, %69 : vector<10x160xf32>
    %71 = vector.extract_strided_slice %51 {offsets = [3, 0], sizes = [10, 84], strides = [1, 1]} : vector<14x84xf32> to vector<10x84xf32>
    %72 = arith.truncf %71 : vector<10x84xf32> to vector<10x84xbf16>
    %c3_50 = arith.constant 3 : index
    %c0_51 = arith.constant 0 : index
    %c0_52 = arith.constant 0 : index
    %73 = vector.load %arg6[%c3_50, %c0_51, %c0_52] : memref<5x84x160xbf16, #tpu.memory_space<vmem>>, vector<1x84x160xbf16>
    %74 = vector.shape_cast %73 : vector<1x84x160xbf16> to vector<84x160xbf16>
    %cst_53 = arith.constant dense<0.000000e+00> : vector<10x160xf32>
    %75 = tpu.matmul %72, %74, %cst_53 {dimension_numbers = #tpu.dot_dimension_numbers<[1], [0], [0], [1], [0, 0, 1, 1], [], []>} : vector<10x84xbf16>, vector<84x160xbf16>, vector<10x160xf32> -> vector<10x160xf32>
    %76 = arith.addf %70, %75 : vector<10x160xf32>
    %77 = vector.extract_strided_slice %51 {offsets = [4, 0], sizes = [10, 84], strides = [1, 1]} : vector<14x84xf32> to vector<10x84xf32>
    %78 = arith.truncf %77 : vector<10x84xf32> to vector<10x84xbf16>
    %c4_54 = arith.constant 4 : index
    %c0_55 = arith.constant 0 : index
    %c0_56 = arith.constant 0 : index
    %79 = vector.load %arg6[%c4_54, %c0_55, %c0_56] : memref<5x84x160xbf16, #tpu.memory_space<vmem>>, vector<1x84x160xbf16>
    %80 = vector.shape_cast %79 : vector<1x84x160xbf16> to vector<84x160xbf16>
    %cst_57 = arith.constant dense<0.000000e+00> : vector<10x160xf32>
    %81 = tpu.matmul %78, %80, %cst_57 {dimension_numbers = #tpu.dot_dimension_numbers<[1], [0], [0], [1], [0, 0, 1, 1], [], []>} : vector<10x84xbf16>, vector<84x160xbf16>, vector<10x160xf32> -> vector<10x160xf32>
    %82 = arith.addf %76, %81 : vector<10x160xf32>
    %c0_58 = arith.constant 0 : index
    %c0_59 = arith.constant 0 : index
    %83 = vector.load %arg7[%c0_58, %c0_59] : memref<1x160xf32, #tpu.memory_space<vmem>>, vector<1x160xf32>
    %84 = vector.broadcast %83 : vector<1x160xf32> to vector<10x160xf32>
    %85 = arith.addf %82, %84 : vector<10x160xf32>
    %cst_60 = arith.constant 0.000000e+00 : f32
    %86 = vector.broadcast %cst_60 : f32 to vector<10x160xf32>
    %87 = arith.maximumf %85, %86 : vector<10x160xf32>
    %c0_61 = arith.constant 0 : index
    %c0_62 = arith.constant 0 : index
    %c0_63 = arith.constant 0 : index
    %88 = vector.load %arg8[%c0_61, %c0_62, %c0_63] : memref<2x5x10xf32, #tpu.memory_space<vmem>>, vector<1x5x10xf32>
    %89 = vector.shape_cast %88 : vector<1x5x10xf32> to vector<5x10xf32>
    %cst_64 = arith.constant dense<0.000000e+00> : vector<5x160xf32>
    %90 = tpu.matmul %89, %87, %cst_64 {dimension_numbers = #tpu.dot_dimension_numbers<[1], [0], [0], [1], [0, 0, 1, 1], [], []>} : vector<5x10xf32>, vector<10x160xf32>, vector<5x160xf32> -> vector<5x160xf32>
    %c1_65 = arith.constant 1 : index
    %c0_66 = arith.constant 0 : index
    %c0_67 = arith.constant 0 : index
    %91 = vector.load %arg8[%c1_65, %c0_66, %c0_67] : memref<2x5x10xf32, #tpu.memory_space<vmem>>, vector<1x5x10xf32>
    %92 = vector.shape_cast %91 : vector<1x5x10xf32> to vector<5x10xf32>
    %cst_68 = arith.constant dense<0.000000e+00> : vector<5x160xf32>
    %93 = tpu.matmul %92, %87, %cst_68 {dimension_numbers = #tpu.dot_dimension_numbers<[1], [0], [0], [1], [0, 0, 1, 1], [], []>} : vector<5x10xf32>, vector<10x160xf32>, vector<5x160xf32> -> vector<5x160xf32>
    %94 = arith.maximumf %90, %93 : vector<5x160xf32>
    %c0_69 = arith.constant 0 : index
    %c0_70 = arith.constant 0 : index
    %c0_71 = arith.constant 0 : index
    %95 = vector.load %arg9[%c0_69, %c0_70, %c0_71] : memref<2x160x80xf32, #tpu.memory_space<vmem>>, vector<1x160x80xf32>
    %96 = vector.shape_cast %95 : vector<1x160x80xf32> to vector<160x80xf32>
    %cst_72 = arith.constant dense<0.000000e+00> : vector<5x80xf32>
    %97 = tpu.matmul %94, %96, %cst_72 {dimension_numbers = #tpu.dot_dimension_numbers<[1], [0], [0], [1], [0, 0, 1, 1], [], []>} : vector<5x160xf32>, vector<160x80xf32>, vector<5x80xf32> -> vector<5x80xf32>
    %c1_73 = arith.constant 1 : index
    %c0_74 = arith.constant 0 : index
    %c0_75 = arith.constant 0 : index
    %98 = vector.load %arg9[%c1_73, %c0_74, %c0_75] : memref<2x160x80xf32, #tpu.memory_space<vmem>>, vector<1x160x80xf32>
    %99 = vector.shape_cast %98 : vector<1x160x80xf32> to vector<160x80xf32>
    %cst_76 = arith.constant dense<0.000000e+00> : vector<5x80xf32>
    %100 = tpu.matmul %94, %99, %cst_76 {dimension_numbers = #tpu.dot_dimension_numbers<[1], [0], [0], [1], [0, 0, 1, 1], [], []>} : vector<5x160xf32>, vector<160x80xf32>, vector<5x80xf32> -> vector<5x80xf32>
    %101 = arith.maximumf %97, %100 : vector<5x80xf32>
    %cst_77 = arith.constant 0.000000e+00 : f32
    %102 = vector.broadcast %cst_77 : f32 to vector<1x120xf32>
    %103 = vector.extract_strided_slice %101 {offsets = [0, 0], sizes = [1, 80], strides = [1, 1]} : vector<5x80xf32> to vector<1x80xf32>
    %104 = arith.truncf %103 : vector<1x80xf32> to vector<1x80xbf16>
    %c0_78 = arith.constant 0 : index
    %c0_79 = arith.constant 0 : index
    %c0_80 = arith.constant 0 : index
    %105 = vector.load %arg10[%c0_78, %c0_79, %c0_80] : memref<5x80x120xbf16, #tpu.memory_space<vmem>>, vector<1x80x120xbf16>
    %106 = vector.shape_cast %105 : vector<1x80x120xbf16> to vector<80x120xbf16>
    %cst_81 = arith.constant dense<0.000000e+00> : vector<1x120xf32>
    %107 = tpu.matmul %104, %106, %cst_81 {dimension_numbers = #tpu.dot_dimension_numbers<[1], [0], [0], [1], [0, 0, 1, 1], [], []>} : vector<1x80xbf16>, vector<80x120xbf16>, vector<1x120xf32> -> vector<1x120xf32>
    %108 = arith.addf %102, %107 : vector<1x120xf32>
    %109 = vector.extract_strided_slice %101 {offsets = [1, 0], sizes = [1, 80], strides = [1, 1]} : vector<5x80xf32> to vector<1x80xf32>
    %110 = arith.truncf %109 : vector<1x80xf32> to vector<1x80xbf16>
    %c1_82 = arith.constant 1 : index
    %c0_83 = arith.constant 0 : index
    %c0_84 = arith.constant 0 : index
    %111 = vector.load %arg10[%c1_82, %c0_83, %c0_84] : memref<5x80x120xbf16, #tpu.memory_space<vmem>>, vector<1x80x120xbf16>
    %112 = vector.shape_cast %111 : vector<1x80x120xbf16> to vector<80x120xbf16>
    %cst_85 = arith.constant dense<0.000000e+00> : vector<1x120xf32>
    %113 = tpu.matmul %110, %112, %cst_85 {dimension_numbers = #tpu.dot_dimension_numbers<[1], [0], [0], [1], [0, 0, 1, 1], [], []>} : vector<1x80xbf16>, vector<80x120xbf16>, vector<1x120xf32> -> vector<1x120xf32>
    %114 = arith.addf %108, %113 : vector<1x120xf32>
    %115 = vector.extract_strided_slice %101 {offsets = [2, 0], sizes = [1, 80], strides = [1, 1]} : vector<5x80xf32> to vector<1x80xf32>
    %116 = arith.truncf %115 : vector<1x80xf32> to vector<1x80xbf16>
    %c2_86 = arith.constant 2 : index
    %c0_87 = arith.constant 0 : index
    %c0_88 = arith.constant 0 : index
    %117 = vector.load %arg10[%c2_86, %c0_87, %c0_88] : memref<5x80x120xbf16, #tpu.memory_space<vmem>>, vector<1x80x120xbf16>
    %118 = vector.shape_cast %117 : vector<1x80x120xbf16> to vector<80x120xbf16>
    %cst_89 = arith.constant dense<0.000000e+00> : vector<1x120xf32>
    %119 = tpu.matmul %116, %118, %cst_89 {dimension_numbers = #tpu.dot_dimension_numbers<[1], [0], [0], [1], [0, 0, 1, 1], [], []>} : vector<1x80xbf16>, vector<80x120xbf16>, vector<1x120xf32> -> vector<1x120xf32>
    %120 = arith.addf %114, %119 : vector<1x120xf32>
    %121 = vector.extract_strided_slice %101 {offsets = [3, 0], sizes = [1, 80], strides = [1, 1]} : vector<5x80xf32> to vector<1x80xf32>
    %122 = arith.truncf %121 : vector<1x80xf32> to vector<1x80xbf16>
    %c3_90 = arith.constant 3 : index
    %c0_91 = arith.constant 0 : index
    %c0_92 = arith.constant 0 : index
    %123 = vector.load %arg10[%c3_90, %c0_91, %c0_92] : memref<5x80x120xbf16, #tpu.memory_space<vmem>>, vector<1x80x120xbf16>
    %124 = vector.shape_cast %123 : vector<1x80x120xbf16> to vector<80x120xbf16>
    %cst_93 = arith.constant dense<0.000000e+00> : vector<1x120xf32>
    %125 = tpu.matmul %122, %124, %cst_93 {dimension_numbers = #tpu.dot_dimension_numbers<[1], [0], [0], [1], [0, 0, 1, 1], [], []>} : vector<1x80xbf16>, vector<80x120xbf16>, vector<1x120xf32> -> vector<1x120xf32>
    %126 = arith.addf %120, %125 : vector<1x120xf32>
    %127 = vector.extract_strided_slice %101 {offsets = [4, 0], sizes = [1, 80], strides = [1, 1]} : vector<5x80xf32> to vector<1x80xf32>
    %128 = arith.truncf %127 : vector<1x80xf32> to vector<1x80xbf16>
    %c4_94 = arith.constant 4 : index
    %c0_95 = arith.constant 0 : index
    %c0_96 = arith.constant 0 : index
    %129 = vector.load %arg10[%c4_94, %c0_95, %c0_96] : memref<5x80x120xbf16, #tpu.memory_space<vmem>>, vector<1x80x120xbf16>
    %130 = vector.shape_cast %129 : vector<1x80x120xbf16> to vector<80x120xbf16>
    %cst_97 = arith.constant dense<0.000000e+00> : vector<1x120xf32>
    %131 = tpu.matmul %128, %130, %cst_97 {dimension_numbers = #tpu.dot_dimension_numbers<[1], [0], [0], [1], [0, 0, 1, 1], [], []>} : vector<1x80xbf16>, vector<80x120xbf16>, vector<1x120xf32> -> vector<1x120xf32>
    %132 = arith.addf %126, %131 : vector<1x120xf32>
    %c0_98 = arith.constant 0 : index
    %c0_99 = arith.constant 0 : index
    %133 = vector.load %arg11[%c0_98, %c0_99] : memref<1x120xf32, #tpu.memory_space<vmem>>, vector<1x120xf32>
    %134 = arith.addf %132, %133 : vector<1x120xf32>
    %cst_100 = arith.constant 0.000000e+00 : f32
    %135 = vector.broadcast %cst_100 : f32 to vector<1x120xf32>
    %136 = arith.maximumf %134, %135 : vector<1x120xf32>
    %c0_101 = arith.constant 0 : index
    %c0_102 = arith.constant 0 : index
    %c0_103 = arith.constant 0 : index
    %137 = vector.load %arg12[%c0_101, %c0_102, %c0_103] : memref<1x1x120xf32, #tpu.memory_space<vmem>>, vector<1x1x120xf32>
    %138 = vector.shape_cast %137 : vector<1x1x120xf32> to vector<1x120xf32>
    %139 = vector.shape_cast %136 : vector<1x120xf32> to vector<1x1x120xf32>
    tpu.vector_store %arg12[%c0_101, %c0_102, %c0_103], %139 {strides = array<i32>} : memref<1x1x120xf32, #tpu.memory_space<vmem>>, vector<1x1x120xf32>,
    return
  }
  func.func @transform_0(%arg0: i32) -> (i32, i32, i32) {
    %c0_i32 = arith.constant 0 : i32
    %c0_i32_0 = arith.constant 0 : i32
    %c0_i32_1 = arith.constant 0 : i32
    return %arg0, %c0_i32, %c0_i32_0 : i32, i32, i32
  }
  func.func @transform_1(%arg0: i32) -> (i32, i32, i32) {
    %c0_i32 = arith.constant 0 : i32
    %c0_i32_0 = arith.constant 0 : i32
    %c0_i32_1 = arith.constant 0 : i32
    %c0_i32_2 = arith.constant 0 : i32
    return %c0_i32, %c0_i32_0, %c0_i32_1 : i32, i32, i32
  }
  func.func @transform_2(%arg0: i32) -> (i32, i32) {
    %c0_i32 = arith.constant 0 : i32
    %c0_i32_0 = arith.constant 0 : i32
    %c0_i32_1 = arith.constant 0 : i32
    return %c0_i32, %c0_i32_0 : i32, i32
  }
  func.func @transform_3(%arg0: i32) -> (i32, i32, i32) {
    %c0_i32 = arith.constant 0 : i32
    %c0_i32_0 = arith.constant 0 : i32
    %c0_i32_1 = arith.constant 0 : i32
    %c0_i32_2 = arith.constant 0 : i32
    return %c0_i32, %c0_i32_0, %c0_i32_1 : i32, i32, i32
  }
  func.func @transform_4(%arg0: i32) -> (i32, i32, i32) {
    %c0_i32 = arith.constant 0 : i32
    %c0_i32_0 = arith.constant 0 : i32
    %c0_i32_1 = arith.constant 0 : i32
    %c0_i32_2 = arith.constant 0 : i32
    return %c0_i32, %c0_i32_0, %c0_i32_1 : i32, i32, i32
  }
  func.func @transform_5(%arg0: i32) -> (i32, i32, i32) {
    %c0_i32 = arith.constant 0 : i32
    %c0_i32_0 = arith.constant 0 : i32
    %c0_i32_1 = arith.constant 0 : i32
    %c0_i32_2 = arith.constant 0 : i32
    return %c0_i32, %c0_i32_0, %c0_i32_1 : i32, i32, i32
  }
  func.func @transform_6(%arg0: i32) -> (i32, i32) {
    %c0_i32 = arith.constant 0 : i32
    %c0_i32_0 = arith.constant 0 : i32
    %c0_i32_1 = arith.constant 0 : i32
    return %c0_i32, %c0_i32_0 : i32, i32
  }
  func.func @transform_7(%arg0: i32) -> (i32, i32, i32) {
    %c0_i32 = arith.constant 0 : i32
    %c0_i32_0 = arith.constant 0 : i32
    %c0_i32_1 = arith.constant 0 : i32
    %c0_i32_2 = arith.constant 0 : i32
    return %c0_i32, %c0_i32_0, %c0_i32_1 : i32, i32, i32
  }
  func.func @transform_8(%arg0: i32) -> (i32, i32, i32) {
    %c0_i32 = arith.constant 0 : i32
    %c0_i32_0 = arith.constant 0 : i32
    %c0_i32_1 = arith.constant 0 : i32
    %c0_i32_2 = arith.constant 0 : i32
    return %c0_i32, %c0_i32_0, %c0_i32_1 : i32, i32, i32
  }
  func.func @transform_9(%arg0: i32) -> (i32, i32, i32) {
    %c0_i32 = arith.constant 0 : i32
    %c0_i32_0 = arith.constant 0 : i32
    %c0_i32_1 = arith.constant 0 : i32
    %c0_i32_2 = arith.constant 0 : i32
    return %c0_i32, %c0_i32_0, %c0_i32_1 : i32, i32, i32
  }
  func.func @transform_10(%arg0: i32) -> (i32, i32) {
    %c0_i32 = arith.constant 0 : i32
    %c0_i32_0 = arith.constant 0 : i32
    %c0_i32_1 = arith.constant 0 : i32
    return %c0_i32, %c0_i32_0 : i32, i32
  }
  func.func @transform_11(%arg0: i32) -> (i32, i32, i32) {
    %c0_i32 = arith.constant 0 : i32
    %c0_i32_0 = arith.constant 0 : i32
    %c0_i32_1 = arith.constant 0 : i32
    return %arg0, %c0_i32, %c0_i32_0 : i32, i32, i32
  }
}

</mosaic_0001>

<bundles_post_ra>
// kernel: truncated_lenet5.1
= control target key start
LH: loop header
LB: loop body
LE: loop exit
PB: predicated region body
PF: predicated region fallthrough
CT: control target
= control target key end

     0   :  { %s4547_s0 = inlined_call_operand.vmem [shape: f32[2,32,32], index: 0, kind: input, shape index: {}]   ;;  %s4548_s1 = inlined_call_operand.vmem [shape: bf16[5,32,168], index: 1, kind: input, shape index: {}]   ;;  %s4549_s2 = inlined_call_operand.vmem [shape: f32[1,168], index: 2, kind: input, shape index: {}]   ;;  %s4550_s3 = inlined_call_operand.vmem [shape: f32[2,14,28], index: 3, kind: input, shape index: {}]   ;;  %s4551_s4 = inlined_call_operand.vmem [shape: f32[2,168,84], index: 4, kind: input, shape index: {}]   ;;  %s4552_s5 = inlined_call_operand.vmem [shape: bf16[5,84,160], index: 5, kind: input, shape index: {}]   ;;  %s4553_s6 = inlined_call_operand.vmem [shape: f32[1,160], index: 6, kind: input, shape index: {}]   ;;  %s4554_s7 = inlined_call_operand.vmem [shape: f32[2,5,10], index: 7, kind: input, shape index: {}]   ;;  %s4555_s8 = inlined_call_operand.vmem [shape: f32[2,160,80], index: 8, kind: input, shape index: {}]   ;;  %s4556_s9 = inlined_call_operand.vmem [shape: bf16[5,80,120], index: 9, kind: input, shape index: {}]   ;;  %s4557_s10 = inlined_call_operand.vmem [shape: f32[1,120], index: 10, kind: input, shape index: {}]   ;;  %s4558_s11 = inlined_call_operand.hbm [shape: f32[2,1,120], index: 11, kind: output, shape index: {}]  }
   0x1   :  { %4559 = sst [smem:[#allocation5_spill]] %s4547_s0 }
   0x2   :  { %16 = vsyncpa [#allocation3], 0 }
   0x3   :  { %18 = vsyncpa [#allocation3 + $0x1], 0  ;;  %s3691_s17 = smov 0   ;;  %s3693_s18 = smov 0  }
   0x4   :  { %s3695_s19 = smov 0   ;;  %s3697_s20 = smov 0  }
   0x5 LB: > { %s3712_s21 = sadd.s32 4294967295, %s3623_s20   ;;  %s2769_s22 = sadd.s32 4294967294, %s3623_s20   ;;  %s3623_s20 = sphi %s3697_s20, %s4566_s20   ;;  %s3619_s19 = sphi %s3695_s19, %s4565_s19   ;;  %s3615_s18 = sphi %s3693_s18, %s4564_s18   ;;  %s3611_s17 = sphi %s3691_s17, %s4563_s17  }
   0x6   : > { %s3716_s23 = sadd.s32 1, %s3623_s20   ;;  %s267_s24 = sadd.s32 1, %s3619_s19 }
   0x7   : > { %s264_s25 = ssub.s32 %s3623_s20, %s3716_s23  ;;  %p277_p0 = scmp.ne.s32.totalorder %s3619_s19, %s3615_s18 }
   0x8   : > { %p265_p1 = scmp.eq.s32.totalorder %s264_s25, 0  ;;  %p278_p2 = scmp.eq.s32.totalorder %s3712_s21, 1 }
   0x9   : > { %p283_p3 = scmp.ne.s32.totalorder %s3615_s18, %s3611_s17  ;;  %p284_p4 = scmp.eq.s32.totalorder %s2769_s22, 1 }
   0xa   : > { %s3727_s26 = scalar_select %p265_p1, %s3619_s19, %s267_s24  }
   0xb   : > { %p3729_p5 = por %p278_p2, %p277_p0  ;;  %p3733_p6 = por %p284_p4, %p283_p3 }
   0xc   : > { %p2772_p7 = scmp.ge.s32.totalorder %s3623_s20, 1  ;;  %p340_p8 = scmp.lt.s32.totalorder %s3623_s20, 3 }
   0xe   : > { %p341_p9 = pnand %p2772_p7, %p340_p8 }
   0xf   : > { %v3421_v0 = vld [vmem:[%s4548_s1 + $0x24] ss:$8 sps:$4 sm:$0xff] (!%p341_p9)   ;;  %p379_p10 = scmp.lt.s32.totalorder (!%p341_p9), %s3712_s21, 1  ;;  %v3423_v1 = vld [vmem:[%s4548_s1 + $0x20] ss:$8 sps:$4 sm:$0xff] (!%p341_p9)   ;;  %v3625_v2 = vmov (!%p341_p9), 0   ;;  %v869_v54 = vlaneseq (!%p341_p9) }
  0x10   : > { %344 = sbr.rel (%p341_p9) target bundleno = 1895 (0x767), region = 64  ;;  %475 = vmatprep.mubr.bf16.mxu0 (!%p341_p9), %v3625_v2  ;;  %485 = vmatprep.mubr.bf16.mxu1 (!%p341_p9), %v3625_v2  ;;  %v3424_v3 = vld [vmem:[%s4548_s1 + $0x34] ss:$8 sps:$4 sm:$0xff] (!%p341_p9)   ;;  %v3426_v4 = vld [vmem:[%s4548_s1 + $0x30] ss:$8 sps:$4 sm:$0xff] (!%p341_p9)   ;;  %s4562_s0 = sld [smem:[#allocation5_spill]] (!%p341_p9) }
  0x11   : > { %443 = vmatprep.subr.bf16.mxu0 (!%p341_p9), %v3421_v0  ;;  %3325 = vmatprep.subr.bf16.mxu1 (!%p341_p9), %v3421_v0  ;;  %v3429_v5 = vld [vmem:[%s4548_s1 + $0x4] ss:$8 sps:$4 sm:$0xff] (!%p341_p9)   ;;  %vm400_vm0 = vsmask.f32 (!%p341_p9), 7424  ;;  %vm436_vm1 = vcmask (!%p341_p9), 261120   ;;  %vm580_vm2 = vcmask (!%p341_p9), 1046528  }
  0x12   : > { %444 = vmatpush1.bf16.msra.mxu0 (!%p341_p9), %v3423_v1  ;;  %3327 = vmatpush1.bf16.msra.mxu1 (!%p341_p9), %v3423_v1  ;;  %v3427_v18 = vld [vmem:[%s4548_s1] ss:$8 sps:$4 sm:$0xff] (!%p341_p9)   ;;  %v3432_v20 = vld [vmem:[%s4548_s1 + $0x14] ss:$8 sps:$4 sm:$0xff] (!%p341_p9)   ;;  %v3430_v22 = vld [vmem:[%s4548_s1 + $0x10] ss:$8 sps:$4 sm:$0xff] (!%p341_p9)  }
  0x13   : > { %445 = vmatprep.subr.bf16.mxu0 (!%p341_p9), %v3424_v3  ;;  %3326 = vmatprep.subr.bf16.mxu1 (!%p341_p9), %v3424_v3  ;;  %v3435_v24 = vld [vmem:[%s4548_s1 + $0x44] ss:$8 sps:$4 sm:$0xff] (!%p341_p9)   ;;  %v3433_v25 = vld [vmem:[%s4548_s1 + $0x40] ss:$8 sps:$4 sm:$0xff] (!%p341_p9)   ;;  %v3438_v26 = vld [vmem:[%s4548_s1 + $0x54] ss:$8 sps:$4 sm:$0xff] (!%p341_p9)  }
  0x14   : > { %v3436_v27 = vld [vmem:[%s4548_s1 + $0x50] ss:$8 sps:$4 sm:$0xff] (!%p341_p9)   ;;  %v3441_v28 = vld [vmem:[%s4548_s1 + $0x64] ss:$8 sps:$4 sm:$0xff] (!%p341_p9)   ;;  %v3439_v31 = vld [vmem:[%s4548_s1 + $0x60] ss:$8 sps:$4 sm:$0xff] (!%p341_p9)  }
  0x15   : > { %v3444_v32 = vld [vmem:[%s4548_s1 + $0x74] ss:$8 sps:$4 sm:$0xff] (!%p341_p9)   ;;  %v3442_v34 = vld [vmem:[%s4548_s1 + $0x70] ss:$8 sps:$4 sm:$0xff] (!%p341_p9)   ;;  %v3447_v35 = vld [vmem:[%s4548_s1 + $0x84] ss:$8 sps:$4 sm:$0xff] (!%p341_p9)  }
  0x16   : > { %446 = vmatpush1.bf16.msra.mxu0 (!%p341_p9), %v3426_v4  ;;  %3328 = vmatpush1.bf16.msra.mxu1 (!%p341_p9), %v3426_v4  ;;  %vm676_vm3 = vsmask.f32 (!%p341_p9), 6400  ;;  %v3445_v43 = vld [vmem:[%s4548_s1 + $0x80] ss:$8 sps:$4 sm:$0xff] (!%p341_p9)   ;;  %v3450_v44 = vld [vmem:[%s4548_s1 + $0x94] ss:$8 sps:$4 sm:$0xff] (!%p341_p9)  }
  0x17   : > { %s380_s16 = scalar_select %p379_p10, %s3712_s21, 1  ;;  %520 = vmatprep.subr.bf16.mxu0 %v3429_v5  ;;  %v3448_v45 = vld [vmem:[%s4548_s1 + $0x90] ss:$8 sps:$4 sm:$0xff]   ;;  %vm776_vm4 = vcmask 1045504   ;;  %v3626_v49 = vmov 0.0   ;;  %v3840_v55 = vshrl.u32 %v869_v54, 7 }
  0x18   : > { %v867_v57 = vld [vmem:[%s4549_s2] sm:$0x3]  ;;  %vm904_vm5 = vcmask 1043456   ;;  %vm3627_vm6 = vmmov 1   ;;  %vm897_vm8 = vcmask 228352   ;;  %vm1099_vm9 = vcmask 326656  }
  0x19   : > { %s3072_s25 = sshll.u32 %s380_s16, 5  ;;  %v871_v56 = vsub.s32 0, %v3840_v55  ;;  %v875_v58 = vsub.s32 1, %v3840_v55  ;;  %vm3178_vm7 = vmpackc.low %vm904_vm5, %vm3627_vm6  ;;  %v1090_v54 = vld [vmem:[%s4551_s4 + $0x60] sm:$0xff]  ;;  %vm1370_vm10 = vcmask 1041408   ;;  %vm1366_vm11 = vcmask 687104  }
  0x1a   : > { %s383_s14 = scalar_lea.vmem %s4562_s0, %s3072_s25  ;;  %vm3254_vm12 = vmpackc.low %vm1370_vm10, %vm3627_vm6  ;;  %v1921_v55 = vld [vmem:[%s4554_s7] sm:$0x1f]  ;;  %vm1922_vm13 = vcmask 80896   ;;  %vm3629_vm14 = vmmov 0   ;;  %vm2321_vm15 = vcmask 654336   ;;  %s377_s15 = sand.u32 1, %s3615_s18  }
  0x1b   : > { %v385_v6 = vld [vmem:[%s383_s14] sm:$0xff]  ;;  %v386_v7 = vld [vmem:[%s383_s14 + $0x8] sm:$0xff]  ;;  %v387_v8 = vld [vmem:[%s383_s14 + $0x10] sm:$0xff]  ;;  %v872_v59 = vrot.slane %v867_v57, %v871_v56  ;;  %v876_v60 = vrot.slane %v867_v57, %v875_v58  ;;  %s3069_s24 = sshll.u32 %s3712_s21, 4  ;;  %s378_s25 = scalar_lea.vmem [#allocation2], %s377_s15 }
  0x1c   : > { %v388_v9 = vld [vmem:[%s383_s14 + $0x18] sm:$0xff]  ;;  %v3761_v10 = vpack.c.bf16 %v386_v7, %v385_v6  ;;  %v1091_v57 = vld [vmem:[%s4551_s4 + $0x68] sm:$0xff]  ;;  %s2714_s29 = sshll.u32 %s378_s25, 4  ;;  %s4505_s13 = scalar_lea.hbm %s4558_s11, %s3069_s24  ;;  %s4507_s29 = int_to_ptr.vmem [resolvable:$true] %s2714_s29 }
  0x1d   : > { %v3763_v11 = vpack.c.bf16 %v388_v9, %v387_v8  ;;  %s2702_s14 = scalar_lea.sflag [#allocation3], %s377_s15  ;;  %s3561_s16 = scalar_lea.vmem %s4507_s29, 16 }
  0x1e   : > { %v402_v12 = vshrl.u32 %v3761_v10, 16  ;;  %v404_v13 = vshll.u32 %v3761_v10, 16  ;;  %v581_v29 = vrot.slane %v3761_v10, 1  ;;  %v777_v46 = vrot.slane %v3761_v10, 2  ;;  %p3562_p11 = scmp.ne.s32.totalorder %s4507_s29, %s3561_s16  ;;  %s3630_s21 = smov [#allocation2]  }
  0x1f   : > { %v409_v14 = vshll.u32 %v3763_v11, 16  ;;  %v413_v19 = vshrl.u32 %v3763_v11, 16  ;;  %v582_v30 = vrot.slane %v3763_v11, 1  ;;  %v778_v47 = vrot.slane %v3763_v11, 2  ;;  %s3565_s22 = sshll.u32 %s3630_s21, 4  ;;  %s3566_s22 = int_to_ptr.vmem [resolvable:$false] %s3565_s22 }
  0x20   : > { %v406_v15 = vrot.slane %v404_v13, 1  ;;  %v677_v36 = vrot.slane %v402_v12, 1  ;;  %v678_v37 = vrot.slane %v404_v13, 2  ;;  %p3563_p12 = pnand %p3562_p11, %p3729_p5  ;;  %s3567_s0 = scalar_lea.vmem %s3566_s22, 32 }
  0x21   : > { %v411_v16 = vrot.slane %v409_v14, 1  ;;  %v583_v33 = vsel %vm580_vm2, %v581_v29, %v582_v30  ;;  %v681_v38 = vrot.slane %v409_v14, 2  ;;  %v680_v39 = vrot.slane %v413_v19, 1  ;;  %p3568_p0 = scmp.lt.s32.totalorder %s4507_s29, %s3566_s22  ;;  %p3569_p1 = scmp.lt.s32.totalorder %s3567_s0, %s3561_s16 }
  0x22   : > { %v407_v17 = vor.u32 %v406_v15, %v402_v12  ;;  %v679_v40 = vor.u32 %v678_v37, %v677_v36  ;;  %v779_v48 = vsel %vm776_vm4, %v777_v46, %v778_v47  ;;  %v3628_v36 = vmov 0.0|0.0   ;;  %v1080_v37 = vld [vmem:[%s4551_s4 + $0x10] sm:$0xff]  ;;  %p3564_p13 = pneg %p3563_p12 }
  0x23   : > { %v415_v23 = vor.u32 %v413_v19, %v411_v16  ;;  %v682_v41 = vor.u32 %v681_v38, %v680_v39  ;;  %v1081_v38 = vld [vmem:[%s4551_s4 + $0x18] sm:$0xff]  ;;  %p3570_p2 = por %p3569_p1, %p3568_p0 }
  0x24   : > { %v412_v21 = vsel %vm400_vm0, %v407_v17, %v411_v16  ;;  %v2826_v39 = vld [vmem:[%s4550_s3 + $0x18] sm:$0x3f]  ;;  %vm2699_vm0 = vcmask 974848  }
  0x25   : > { %2783 = vmatmul.mubr.msk.bf16.vlgmr.msra.gmra.mrb[0].mxu0 %vm436_vm1, %v412_v21  ;;  %2784 = vmatmul.mubr.msk.bf16.vlgmr.msra.gmra.mrb[0].mxu1 %vm436_vm1, %v415_v23  ;;  %v683_v42 = vsel %vm676_vm3, %v679_v40, %v682_v41  ;;  %v3197_v40 = vpack.c.bf16 %v1081_v38, %v1080_v37  ;;  %v2845_v38 = vld [vmem:[%s4551_s4 + $0x108] sm:$0xff]  ;;  %p3571_p3 = pnand %p3570_p2, %p3564_p13 }
  0x26   : > { %521 = vmatpush1.bf16.msra.mxu0 %v3427_v18  ;;  %552 = vmatprep.mubr.bf16.mxu0 %v3625_v2 }
  0x27   : > { %522 = vmatprep.subr.bf16.mxu0 %v3432_v20  ;;  %975 = vmatprep.mubr.f32.mxu1 %v3626_v49 }
  0x2a   : > { %523 = vmatpush1.bf16.msra.mxu0 %v3430_v22 }
  0x2b   : > { %610 = vmatprep.subr.bf16.mxu0 %v3435_v24 }
  0x31   : > { %2789 = vmatmul.mubr.msk.bf16.vlgmr.msra.gmra.mrb[0].mxu0 %vm436_vm1, %v3761_v10 }
  0x32   : > { %611 = vmatpush1.bf16.msra.mxu0 %v3433_v25  ;;  %562 = vmatprep.mubr.bf16.mxu0 %v3625_v2 }
  0x33   : > { %612 = vmatprep.subr.bf16.mxu0 %v3438_v26 }
  0x36   : > { %613 = vmatpush1.bf16.msra.mxu0 %v3436_v27 }
  0x37   : > { %710 = vmatprep.subr.bf16.mxu0 %v3441_v28 }
  0x39   : > { %2790 = vmatmul.mubr.msk.bf16.gmra.mrb[4].mxu0 %vm436_vm1, %v3763_v11 }
  0x3a   : > { %642 = vmatprep.mubr.bf16.mxu0 %v3625_v2 }
  0x41   : > { %2799 = vmatmul.mubr.msk.bf16.vlgmr.msra.gmra.mrb[0].mxu0 %vm436_vm1, %v583_v33  ;;  %v1079_v33 = vld [vmem:[%s4551_s4 + $0x8] sm:$0xff] }
  0x42   : > { %711 = vmatpush1.bf16.msra.mxu0 %v3439_v31  ;;  %652 = vmatprep.mubr.bf16.mxu0 %v3625_v2  ;;  %v896_v31 = vld [vmem:[%s4550_s3 + $0x8] sm:$0x3f] }
  0x43   : > { %712 = vmatprep.subr.bf16.mxu0 %v3444_v32  ;;  %v1078_v32 = vld [vmem:[%s4551_s4] sm:$0xff] }
  0x46   : > { %713 = vmatpush1.bf16.msra.mxu0 %v3442_v34  ;;  %v2825_v34 = vld [vmem:[%s4550_s3 + $0x10] sm:$0xff] }
  0x47   : > { %806 = vmatprep.subr.bf16.mxu0 %v3447_v35  ;;  %v3194_v35 = vpack.c.bf16 %v1079_v33, %v1078_v32  ;;  %v2842_v32 = vld [vmem:[%s4551_s4 + $0xf0] sm:$0xff] }
  0x49   : > { %2800 = vmatmul.mubr.msk.bf16.gmra.mrb[4].mxu0 %vm436_vm1, %v582_v30  ;;  %v895_v30 = vld [vmem:[%s4550_s3] sm:$0xff] }
  0x4a   : > { %742 = vmatprep.mubr.bf16.mxu0 %v3625_v2 }
  0x51   : > { %2809 = vmatmul.mubr.msk.bf16.vlgmr.msra.gmra.mrb[0].mxu0 %vm436_vm1, %v683_v42  ;;  %v1083_v42 = vld [vmem:[%s4551_s4 + $0x28] sm:$0xff] }
  0x52   : > { %807 = vmatpush1.bf16.msra.mxu0 %v3445_v43  ;;  %752 = vmatprep.mubr.bf16.mxu0 %v3625_v2 }
  0x53   : > { %808 = vmatprep.subr.bf16.mxu0 %v3450_v44  ;;  %v1084_v44 = vld [vmem:[%s4551_s4 + $0x30] sm:$0xff] }
  0x56   : > { %809 = vmatpush1.bf16.msra.mxu0 %v3448_v45  ;;  %v1085_v45 = vld [vmem:[%s4551_s4 + $0x38] sm:$0xff] }
  0x57   : > { %v3203_v46 = vpack.c.bf16 %v1085_v45, %v1084_v44  ;;  %v2849_v44 = vld [vmem:[%s4551_s4 + $0x128] sm:$0xff]  ;;  %v2850_v45 = vld [vmem:[%s4551_s4 + $0x130] sm:$0xff] }
  0x59   : > { %2810 = vmatmul.mubr.msk.bf16.gmra.mrb[4].mxu0 %vm436_vm1, %v682_v41  ;;  %v1082_v41 = vld [vmem:[%s4551_s4 + $0x20] sm:$0xff] }
  0x5a   : > { %838 = vmatprep.mubr.bf16.mxu0 %v3625_v2  ;;  %v3200_v43 = vpack.c.bf16 %v1083_v42, %v1082_v41  ;;  %v2847_v41 = vld [vmem:[%s4551_s4 + $0x118] sm:$0xff]  ;;  %v2848_v42 = vld [vmem:[%s4551_s4 + $0x120] sm:$0xff] }
  0x61   : > { %2819 = vmatmul.mubr.msk.bf16.vlgmr.msra.gmra.mrb[0].mxu0 %vm436_vm1, %v779_v48  ;;  %v1087_v48 = vld [vmem:[%s4551_s4 + $0x48] sm:$0xff] }
  0x62   : > { %848 = vmatprep.mubr.bf16.mxu0 %v3625_v2 }
  0x69   : > { %2820 = vmatmul.mubr.msk.bf16.gmra.mrb[4].mxu0 %vm436_vm1, %v778_v47  ;;  %v1086_v47 = vld [vmem:[%s4551_s4 + $0x40] sm:$0xff] }
  0x6a   : > { %1409 = vmatprep.mubr.bf16.mxu0 %v3625_v2 }
  0xf8   : > { %v487_v50 = vpop.f32.mrb[0].mxu1 }
  0xf9   : > { %v489_v51 = vpop.f32.mrb[1].mxu1 }
  0xfa   : > { %v491_v52 = vpop.f32.mrb[2].mxu1 }
  0xfb   : > { %v493_v53 = vpop.f32.mrb[3].mxu1 }
 0x134   : > { %v840_v61 = vpop.f32.mrb[0].mxu0 }
 0x135   : > { %v879_v62 = vadd.f32 %v872_v59, %v840_v61  ;;  %v842_v63 = vpop.f32.mrb[1].mxu0  ;;  %v1093_v61 = vld [vmem:[%s4551_s4 + $0x78] sm:$0xff] }
 0x136   : > { %v880_v0 = vadd.f32 %v876_v60, %v842_v63  ;;  %v844_v1 = vpop.f32.mrb[2].mxu0  ;;  %v1094_v63 = vld [vmem:[%s4551_s4 + $0x80] sm:$0xff] }
 0x137   : > { %v881_v3 = vadd.f32 %v872_v59, %v844_v1  ;;  %v846_v4 = vpop.f32.mrb[3].mxu0  ;;  %v887_v6 = vmax.f32 %v879_v62, 0.0 }
 0x138   : > { %v882_v5 = vadd.f32 %v876_v60, %v846_v4  ;;  %v888_v8 = vmax.f32 %v880_v0, 0.0  ;;  %v1095_v0 = vld [vmem:[%s4551_s4 + $0x88] sm:$0xff]  ;;  %v1097_v4 = vld [vmem:[%s4551_s4 + $0x98] sm:$0xff] }
 0x139   : > { %v889_v7 = vmax.f32 %v881_v3, 0.0  ;;  %v3218_v1 = vpack.c.bf16 %v1095_v0, %v1094_v63  ;;  %v1096_v3 = vld [vmem:[%s4551_s4 + $0x90] sm:$0xff]  ;;  %v3465_v63 = vld [vmem:[%s4552_s5 + $0x9c] ss:$8 sps:$4 sm:$0xff]   ;;  %v3463_v0 = vld [vmem:[%s4552_s5 + $0x98] ss:$8 sps:$4 sm:$0xff]  }
 0x13a   : > { %v890_v9 = vmax.f32 %v882_v5, 0.0  ;;  %v3221_v5 = vpack.c.bf16 %v1097_v4, %v1096_v3 }
 0x13b   : > { %v3175_v10 = vpack.c.bf16 %v889_v7, %v887_v6  ;;  %v1098_v6 = vld [vmem:[%s4551_s4 + $0xa0] sm:$0xff] }
 0x13c   : > { %v3173_v11 = vpack.c.bf16 %v890_v9, %v888_v8  ;;  %v850_v12 = vpop.f32.mrb[4].mxu0 }
 0x13d   : > { %v3329_v13 = vadd.f32 %v850_v12, %v487_v50  ;;  %v852_v14 = vpop.f32.mrb[5].mxu0  ;;  %v3206_v50 = vpack.c.bf16 %v1087_v48, %v1086_v47  ;;  %v2834_v12 = vld [vmem:[%s4551_s4 + $0xb0] sm:$0xff]  ;;  %v2851_v47 = vld [vmem:[%s4551_s4 + $0x138] sm:$0xff]  ;;  %v2852_v48 = vld [vmem:[%s4551_s4 + $0x140] sm:$0xff] }
 0x13e   : > { %v3330_v15 = vadd.f32 %v852_v14, %v489_v51  ;;  %v854_v16 = vpop.f32.mrb[6].mxu0  ;;  %3174 = vmatprep.subr.bf16.mxu1 %v3173_v11  ;;  %v1088_v51 = vld [vmem:[%s4551_s4 + $0x50] sm:$0xff] }
 0x13f   : > { %v883_v17 = vadd.f32 %v3329_v13, %v872_v59  ;;  %v3331_v18 = vadd.f32 %v854_v16, %v491_v52  ;;  %v856_v19 = vpop.f32.mrb[7].mxu0  ;;  %3176 = vmatpush1.bf16.msra.mxu1 %v3175_v10  ;;  %v1089_v52 = vld [vmem:[%s4551_s4 + $0x58] sm:$0xff] }
 0x140   : > { %v884_v20 = vadd.f32 %v3330_v15, %v876_v60  ;;  %v3332_v21 = vadd.f32 %v856_v19, %v493_v53  ;;  %v3209_v53 = vpack.c.bf16 %v1089_v52, %v1088_v51  ;;  %v2836_v19 = vld [vmem:[%s4551_s4 + $0xc0] sm:$0xff]  ;;  %v2853_v51 = vld [vmem:[%s4551_s4 + $0x148] sm:$0xff] }
 0x141   : > { %v885_v22 = vadd.f32 %v3331_v18, %v872_v59  ;;  %v891_v24 = vmax.f32 %v883_v17, 0.0  ;;  %v3212_v59 = vpack.c.bf16 %v1091_v57, %v1090_v54  ;;  %v2835_v18 = vld [vmem:[%s4551_s4 + $0xb8] sm:$0xff]  ;;  %v3456_v54 = vld [vmem:[%s4552_s5 + $0x6c] ss:$8 sps:$4 sm:$0xff]   ;;  %v3454_v57 = vld [vmem:[%s4552_s5 + $0x68] ss:$8 sps:$4 sm:$0xff]  }
 0x142   : > { %v886_v23 = vadd.f32 %v3332_v21, %v876_v60  ;;  %v892_v26 = vmax.f32 %v884_v20, 0.0  ;;  %v1092_v60 = vld [vmem:[%s4551_s4 + $0x70] sm:$0xff]  ;;  %v3451_v52 = vld [vmem:[%s4552_s5 + $0x58] ss:$8 sps:$4 sm:$0xff]  }
 0x143   : > { %v893_v25 = vmax.f32 %v885_v22, 0.0  ;;  %v3215_v62 = vpack.c.bf16 %v1093_v61, %v1092_v60  ;;  %v3457_v60 = vld [vmem:[%s4552_s5 + $0x78] ss:$8 sps:$4 sm:$0xff]   ;;  %v3462_v61 = vld [vmem:[%s4552_s5 + $0x8c] ss:$8 sps:$4 sm:$0xff]  }
 0x144   : > { %v894_v27 = vmax.f32 %v886_v23, 0.0 }
 0x145   : > { %v3180_v28 = vpack.c.bf16 %v893_v25, %v891_v24  ;;  %v3227_v24 = vpack.c.bf16 %v2836_v19, %v2835_v18  ;;  %v2837_v25 = vld [vmem:[%s4551_s4 + $0xc8] sm:$0xff] }
 0x146   : > { %v3177_v29 = vpack.c.bf16 %v894_v27, %v892_v26  ;;  %v2838_v26 = vld [vmem:[%s4551_s4 + $0xd0] sm:$0xff] }
 0x147   : > { %v3230_v27 = vpack.c.bf16 %v2838_v26, %v2837_v25  ;;  %v3473_v25 = vld [vmem:[%s4552_s5 + $0x14] ss:$8 sps:$4 sm:$0xff]  }
 0x148   : > { %3179 = vmatprep.subr.msk.bf16.mxu1 %vm3178_vm7, %v3177_v29 }
 0x149   : > { %3182 = vmatpush1.bf16.msk.msra.mxu1 %vm3178_vm7, %v3180_v28 }
 0x14a   : > { %3184 = vmatprep.subr.bf16.mxu1 %v3173_v11  ;;  %v2833_v11 = vld [vmem:[%s4551_s4 + $0xa8] sm:$0xff] }
 0x14b   : > { %v3224_v17 = vpack.c.bf16 %v2834_v12, %v2833_v11 }
 0x14c   : > { %2823 = vmatmul.mubr.msk.f32.vlgmr.msra.gmra.mrb[4].mxu1 %vm897_vm8, %v895_v30 }
 0x14d   : > { %3186 = vmatpush1.bf16.msra.mxu1 %v3175_v10  ;;  %981 = vmatprep.mubr.f32.mxu1 %v3626_v49 }
 0x14e   : > { %3189 = vmatprep.subr.msk.bf16.mxu1 %vm3178_vm7, %v3177_v29  ;;  %v2840_v29 = vld [vmem:[%s4551_s4 + $0xe0] sm:$0xff] }
 0x150   : > { %2824 = vmatmul.mubr.msk.f32.gmra.mrb[6].mxu1 %vm897_vm8, %v896_v31  ;;  %v2841_v31 = vld [vmem:[%s4551_s4 + $0xe8] sm:$0xff] }
 0x151   : > { %3192 = vmatpush1.bf16.msk.msra.mxu1 %vm3178_vm7, %v3180_v28  ;;  %1061 = vmatprep.mubr.f32.mxu1 %v3626_v49  ;;  %v2839_v28 = vld [vmem:[%s4551_s4 + $0xd8] sm:$0xff]  ;;  %v3236_v33 = vpack.c.bf16 %v2842_v32, %v2841_v31  ;;  %v3482_v32 = vld [vmem:[%s4552_s5 + $0x44] ss:$8 sps:$4 sm:$0xff]  }
 0x152   : > { %3193 = vmatprep.subr.bf16.mxu1 %v3628_v36  ;;  %v3233_v30 = vpack.c.bf16 %v2840_v29, %v2839_v28  ;;  %v3476_v28 = vld [vmem:[%s4552_s5 + $0x24] ss:$8 sps:$4 sm:$0xff]   ;;  %v3474_v29 = vld [vmem:[%s4552_s5 + $0x20] ss:$8 sps:$4 sm:$0xff]   ;;  %v3477_v31 = vld [vmem:[%s4552_s5 + $0x30] ss:$8 sps:$4 sm:$0xff]  }
 0x154   : > { %2829 = vmatmul.mubr.msk.f32.vlgmr.msra.gmra.mrb[8].mxu1 %vm897_vm8, %v2825_v34  ;;  %v2843_v34 = vld [vmem:[%s4551_s4 + $0xf8] sm:$0xff] }
 0x155   : > { %1067 = vmatprep.mubr.f32.mxu1 %v3626_v49  ;;  %3195 = vmatpush1.bf16.msra.mxu1 %v3194_v35  ;;  %v2844_v35 = vld [vmem:[%s4551_s4 + $0x100] sm:$0xff] }
 0x156   : > { %3196 = vmatprep.subr.bf16.mxu1 %v3628_v36  ;;  %v3239_v37 = vpack.c.bf16 %v2844_v35, %v2843_v34  ;;  %v3480_v34 = vld [vmem:[%s4552_s5 + $0x40] ss:$8 sps:$4 sm:$0xff]  }
 0x158   : > { %2830 = vmatmul.mubr.msk.f32.gmra.mrb[10].mxu1 %vm897_vm8, %v2826_v39  ;;  %v2846_v39 = vld [vmem:[%s4551_s4 + $0x110] sm:$0xff] }
 0x159   : > { %3198 = vmatpush1.bf16.msra.mxu1 %v3197_v40  ;;  %v3242_v40 = vpack.c.bf16 %v2846_v39, %v2845_v38  ;;  %v3487_v39 = vld [vmem:[%s4552_s5 + $0xb4] ss:$8 sps:$4 sm:$0xff]  }
 0x15a   : > { %3199 = vmatprep.subr.bf16.mxu1 %v3628_v36 }
 0x15d   : > { %3201 = vmatpush1.bf16.msra.mxu1 %v3200_v43  ;;  %v3245_v43 = vpack.c.bf16 %v2848_v42, %v2847_v41  ;;  %v3490_v41 = vld [vmem:[%s4552_s5 + $0xc4] ss:$8 sps:$4 sm:$0xff]   ;;  %v3488_v42 = vld [vmem:[%s4552_s5 + $0xc0] ss:$8 sps:$4 sm:$0xff]  }
 0x15e   : > { %3202 = vmatprep.subr.bf16.mxu1 %v3628_v36 }
 0x161   : > { %3204 = vmatpush1.bf16.msra.mxu1 %v3203_v46  ;;  %v3248_v46 = vpack.c.bf16 %v2850_v45, %v2849_v44  ;;  %v3491_v44 = vld [vmem:[%s4552_s5 + $0xd0] ss:$8 sps:$4 sm:$0xff]   ;;  %v3496_v45 = vld [vmem:[%s4552_s5 + $0xe4] ss:$8 sps:$4 sm:$0xff]  }
 0x162   : > { %3205 = vmatprep.subr.bf16.mxu1 %v3628_v36 }
 0x165   : > { %3207 = vmatpush1.bf16.msra.mxu1 %v3206_v50  ;;  %v3251_v50 = vpack.c.bf16 %v2852_v48, %v2851_v47  ;;  %v3499_v47 = vld [vmem:[%s4552_s5 + $0xf4] ss:$8 sps:$4 sm:$0xff]   ;;  %v2905_v48 = vld [vmem:[%s4552_s5 + $0x100] sm:$0x33] }
 0x166   : > { %3208 = vmatprep.subr.bf16.mxu1 %v3628_v36 }
 0x169   : > { %3210 = vmatpush1.bf16.msra.mxu1 %v3209_v53  ;;  %v3453_v53 = vld [vmem:[%s4552_s5 + $0x5c] ss:$8 sps:$4 sm:$0xff]  }
 0x16a   : > { %3211 = vmatprep.subr.bf16.mxu1 %v3628_v36  ;;  %1377 = vmatprep.subr.bf16.mxu0 %v3453_v53 }
 0x16b   : > { %1378 = vmatpush1.bf16.msra.mxu0 %v3451_v52  ;;  %v2916_v52 = vcombine.low %v2905_v48, %v2905_v48 }
 0x16c   : > { %1379 = vmatprep.subr.bf16.mxu0 %v3456_v54  ;;  %v3504_v54 = vld [vmem:[%s4552_s5 + $0x10c] ss:$8 sps:$4 sm:$0xff]  }
 0x16d   : > { %3213 = vmatpush1.bf16.msra.mxu1 %v3212_v59  ;;  %v3459_v59 = vld [vmem:[%s4552_s5 + $0x7c] ss:$8 sps:$4 sm:$0xff]   ;;  %v1599_v53 = vsel %vm1370_vm10, %v2916_v52, 0 }
 0x16e   : > { %3214 = vmatprep.subr.bf16.mxu1 %v3628_v36 }
 0x16f   : > { %1380 = vmatpush1.bf16.msra.mxu0 %v3454_v57  ;;  %v3502_v57 = vld [vmem:[%s4552_s5 + $0x108] ss:$8 sps:$4 sm:$0xff]  }
 0x170   : > { %1381 = vmatprep.subr.bf16.mxu0 %v3459_v59 }
 0x171   : > { %3216 = vmatpush1.bf16.msra.mxu1 %v3215_v62  ;;  %v3460_v62 = vld [vmem:[%s4552_s5 + $0x88] ss:$8 sps:$4 sm:$0xff]  }
 0x172   : > { %3217 = vmatprep.subr.bf16.mxu1 %v3628_v36 }
 0x173   : > { %1382 = vmatpush1.bf16.msra.mxu0 %v3457_v60  ;;  %v3507_v60 = vld [vmem:[%s4552_s5 + $0x11c] ss:$8 sps:$4 sm:$0xff]  }
 0x174   : > { %1383 = vmatprep.subr.bf16.mxu0 %v3462_v61  ;;  %v3505_v61 = vld [vmem:[%s4552_s5 + $0x118] ss:$8 sps:$4 sm:$0xff]  }
 0x175   : > { %3219 = vmatpush1.bf16.msra.mxu1 %v3218_v1  ;;  %v2866_v1 = vld [vmem:[%s4552_s5 + $0xa8] sm:$0x33] }
 0x176   : > { %3220 = vmatprep.subr.bf16.mxu1 %v3628_v36  ;;  %v2878_v3 = vcombine.high %v2866_v1, %v2866_v1  ;;  %v2877_v4 = vcombine.low %v2866_v1, %v2866_v1  ;;  %v3511_v1 = vld [vmem:[%s4552_s5 + $0x138] ss:$8 sps:$4 sm:$0xff]  }
 0x177   : > { %1384 = vmatpush1.bf16.msra.mxu0 %v3460_v62  ;;  %v3510_v62 = vld [vmem:[%s4552_s5 + $0x12c] ss:$8 sps:$4 sm:$0xff]  }
 0x178   : > { %1385 = vmatprep.subr.bf16.mxu0 %v3465_v63  ;;  %v3508_v63 = vld [vmem:[%s4552_s5 + $0x128] ss:$8 sps:$4 sm:$0xff]  }
 0x179   : > { %3222 = vmatpush1.bf16.msra.mxu1 %v3221_v5  ;;  %v1372_v5 = vsel %vm1370_vm10, %v2877_v4, 0  ;;  %v2930_v4 = vld [vmem:[%s4552_s5 + $0x158] sm:$0x33] }
 0x17a   : > { %1146 = vmatprep.subr.mxu1 %v3626_v49 }
 0x17b   : > { %1386 = vmatpush1.bf16.msra.mxu0 %v3463_v0  ;;  %v3513_v0 = vld [vmem:[%s4552_s5 + $0x13c] ss:$8 sps:$4 sm:$0xff]  }
 0x17c   : > { %2879 = vmatprep.subr.msk.bf16.mxu0 %vm1370_vm10, %v2878_v3  ;;  %v3516_v3 = vld [vmem:[%s4552_s5 + $0x14c] ss:$8 sps:$4 sm:$0xff]  }
 0x17d   : > { %1147 = vmatpush1.msra.mxu1 %v1098_v6  ;;  %v3470_v6 = vld [vmem:[%s4552_s5 + $0x4] ss:$8 sps:$4 sm:$0xff]  }
 0x17e   : > { %3223 = vmatprep.subr.bf16.mxu1 %v3628_v36 }
 0x17f   : > { %1388 = vmatpush1.bf16.msra.mxu0 %v1372_v5  ;;  %v3514_v5 = vld [vmem:[%s4552_s5 + $0x148] ss:$8 sps:$4 sm:$0xff]  }
 0x180   : > { %1483 = vmatprep.subr.bf16.mxu0 %v3470_v6  ;;  %v2942_v6 = vcombine.high %v2930_v4, %v2930_v4 }
 0x21f   : > { %v977_v7 = vpop.f32.mrb[4].mxu1 }
 0x220   : > { %v979_v8 = vpop.f32.mrb[5].mxu1 }
 0x223   : > { %v983_v9 = vpop.f32.mrb[6].mxu1 }
 0x224   : > { %v985_v10 = vpop.f32.mrb[7].mxu1 }
 0x227   : > { %v1063_v13 = vpop.f32.mrb[8].mxu1 }
 0x228   : > { %v1074_v14 = vmax.f32 %v977_v7, %v1063_v13  ;;  %v1065_v15 = vpop.f32.mrb[9].mxu1 }
 0x229   : > { %v1075_v16 = vmax.f32 %v979_v8, %v1065_v15 }
 0x22b   : > { %v1069_v20 = vpop.f32.mrb[10].mxu1  ;;  %2831 = vmatprep.mubr.msk.f32.mxu1 %vm1099_vm9, %v1075_v16 }
 0x22c   : > { %v1076_v21 = vmax.f32 %v983_v9, %v1069_v20  ;;  %v1071_v22 = vpop.f32.mrb[11].mxu1  ;;  %1171 = vmatmul.mubr.f32.vlgmr.msra.gmra.mrb[12].mxu1 %v1074_v14 }
 0x22d   : > { %v1077_v23 = vmax.f32 %v985_v10, %v1071_v22  ;;  %3225 = vmatpush1.bf16.msra.mxu1 %v3224_v17 }
 0x22e   : > { %3226 = vmatprep.subr.bf16.mxu1 %v3628_v36 }
 0x22f   : > { %2832 = vmatprep.mubr.msk.f32.mxu1 %vm1099_vm9, %v1077_v23 }
 0x230   : > { %1176 = vmatmul.mubr.f32.gmra.mrb[14].mxu1 %v1076_v21 }
 0x231   : > { %3228 = vmatpush1.bf16.msra.mxu1 %v3227_v24  ;;  %2854 = vmatprep.mubr.msk.f32.mxu1 %vm1099_vm9, %v1075_v16 }
 0x232   : > { %3229 = vmatprep.subr.bf16.mxu1 %v3628_v36 }
 0x235   : > { %3231 = vmatpush1.bf16.msra.mxu1 %v3230_v27  ;;  %v3471_v27 = vld [vmem:[%s4552_s5 + $0x10] ss:$8 sps:$4 sm:$0xff]  }
 0x236   : > { %3232 = vmatprep.subr.bf16.mxu1 %v3628_v36 }
 0x239   : > { %3234 = vmatpush1.bf16.msra.mxu1 %v3233_v30  ;;  %v3479_v30 = vld [vmem:[%s4552_s5 + $0x34] ss:$8 sps:$4 sm:$0xff]  }
 0x23a   : > { %3235 = vmatprep.subr.bf16.mxu1 %v3628_v36 }
 0x23d   : > { %3237 = vmatpush1.bf16.msra.mxu1 %v3236_v33  ;;  %v1291_v33 = vld [vmem:[%s4552_s5 + $0x50] sm:$0x33] }
 0x23e   : > { %3238 = vmatprep.subr.bf16.mxu1 %v3628_v36  ;;  %v2892_v35 = vcombine.high %v1291_v33, %v1291_v33 }
 0x241   : > { %3240 = vmatpush1.bf16.msra.mxu1 %v3239_v37  ;;  %v2891_v37 = vcombine.low %v1291_v33, %v1291_v33 }
 0x242   : > { %3241 = vmatprep.subr.bf16.mxu1 %v3628_v36 }
 0x243   : > { %v1478_v38 = vsel %vm1370_vm10, %v2891_v37, 0 }
 0x245   : > { %3243 = vmatpush1.bf16.msra.mxu1 %v3242_v40  ;;  %v3485_v40 = vld [vmem:[%s4552_s5 + $0xb0] ss:$8 sps:$4 sm:$0xff]  }
 0x246   : > { %3244 = vmatprep.subr.bf16.mxu1 %v3628_v36 }
 0x249   : > { %3246 = vmatpush1.bf16.msra.mxu1 %v3245_v43  ;;  %v3493_v43 = vld [vmem:[%s4552_s5 + $0xd4] ss:$8 sps:$4 sm:$0xff]  }
 0x24a   : > { %3247 = vmatprep.subr.bf16.mxu1 %v3628_v36 }
 0x24d   : > { %3249 = vmatpush1.bf16.msra.mxu1 %v3248_v46  ;;  %v3494_v46 = vld [vmem:[%s4552_s5 + $0xe0] ss:$8 sps:$4 sm:$0xff]  }
 0x24e   : > { %3250 = vmatprep.subr.bf16.mxu1 %v3628_v36 }
 0x251   : > { %3252 = vmatpush1.bf16.msra.mxu1 %v3251_v50  ;;  %v3497_v50 = vld [vmem:[%s4552_s5 + $0xf0] ss:$8 sps:$4 sm:$0xff]  }
 0x252   : > { %1243 = vmatprep.subr.mxu1 %v3626_v49 }
 0x255   : > { %1244 = vmatpush1.msra.mxu1 %v2853_v51  ;;  %v2917_v51 = vcombine.high %v2905_v48, %v2905_v48 }
 0x256   : > { %1268 = vmatmul.mubr.f32.vlgmr.msra.gmra.mrb[16].mxu1 %v1074_v14 }
 0x257   : > { %2855 = vmatprep.mubr.msk.f32.mxu1 %vm1099_vm9, %v1077_v23  ;;  %v3468_v23 = vld [vmem:[%s4552_s5] ss:$8 sps:$4 sm:$0xff]  }
 0x25a   : > { %1273 = vmatmul.mubr.f32.gmra.mrb[18].mxu1 %v1076_v21 }
 0x25b   : > { %1996 = vmatprep.mubr.f32.mxu1 %v3626_v49 }
 0x2ff   : > { %v1172_v7 = vpop.f32.mrb[12].mxu1 }
 0x300   : > { %v1174_v8 = vpop.f32.mrb[13].mxu1 }
 0x303   : > { %v1177_v9 = vpop.f32.mrb[14].mxu1 }
 0x304   : > { %v1179_v10 = vpop.f32.mrb[15].mxu1 }
 0x305   : > { %v3519_v10 = vld [vmem:[%s4552_s5 + $0x160] ss:$8 sps:$4 sm:$0xff]  }
 0x329   : > { %v1269_v11 = vpop.f32.mrb[16].mxu1 }
 0x32a   : > { %v1278_v12 = vmax.f32 %v1172_v7, %v1269_v11  ;;  %v1271_v13 = vpop.f32.mrb[17].mxu1  ;;  %v2941_v7 = vcombine.low %v2930_v4, %v2930_v4  ;;  %v3524_v11 = vld [vmem:[%s4552_s5 + $0x174] ss:$8 sps:$4 sm:$0xff]  }
 0x32b   : > { %v3527_v13 = vld [vmem:[%s4552_s5 + $0x184] ss:$8 sps:$4 sm:$0xff]  }
 0x32c   : > { %v1725_v8 = vsel %vm1370_vm10, %v2941_v7, 0 }
 0x32d   : > { %v1274_v14 = vpop.f32.mrb[18].mxu1 }
 0x32e   : > { %v1279_v15 = vmax.f32 %v1177_v9, %v1274_v14  ;;  %v1276_v16 = vpop.f32.mrb[19].mxu1  ;;  %v3521_v9 = vld [vmem:[%s4552_s5 + $0x164] ss:$8 sps:$4 sm:$0xff]   ;;  %v3525_v14 = vld [vmem:[%s4552_s5 + $0x180] ss:$8 sps:$4 sm:$0xff]  }
 0x32f   : > { %v3533_v16 = vld [vmem:[%s4552_s5 + $0x1a4] ss:$8 sps:$4 sm:$0xff]  }
 0x330   : > { %v4062_v17 = vpack.c.bf16 %v1279_v15, %v1278_v12  ;;  %v3522_v12 = vld [vmem:[%s4552_s5 + $0x170] ss:$8 sps:$4 sm:$0xff]   ;;  %v3530_v15 = vld [vmem:[%s4552_s5 + $0x194] ss:$8 sps:$4 sm:$0xff]  }
 0x332   : > { %v1305_v18 = vshrl.u32 %v4062_v17, 16  ;;  %v1307_v19 = vshll.u32 %v4062_v17, 16  ;;  %v1539_v59 = vrot.slane %v4062_v17, 1 }
 0x334   : > { %v1309_v20 = vrot.slane %v1307_v19, 1  ;;  %v4066_v21 = vrot.slane %v1305_v18, 1  ;;  %v4068_v22 = vrot.slane %v1307_v19, 2  ;;  %v3531_v19 = vld [vmem:[%s4552_s5 + $0x1a0] ss:$8 sps:$4 sm:$0xff]  }
 0x336   : > { %v1310_v24 = vor.u32 %v1309_v20, %v1305_v18  ;;  %v1665_v26 = vor.u32 %v4068_v22, %v4066_v21  ;;  %v2955_v18 = vld [vmem:[%s4552_s5 + $0x1b0] sm:$0x33] }
 0x337   : > { %v2967_v20 = vcombine.high %v2955_v18, %v2955_v18  ;;  %v2966_v21 = vcombine.low %v2955_v18, %v2955_v18 }
 0x338   : > { %2880 = vmatmul.mubr.msk.bf16.vlgmr.msra.gmra.mrb[8].mxu0 %vm1366_vm11, %v1310_v24  ;;  %v1901_v24 = vld [vmem:[%s4553_s6] sm:$0x3] }
 0x339   : > { %1484 = vmatpush1.bf16.msra.mxu0 %v3468_v23  ;;  %1515 = vmatprep.mubr.bf16.mxu0 %v3625_v2  ;;  %v1849_v22 = vsel %vm1370_vm10, %v2966_v21, 0  ;;  %v1789_v23 = vrot.slane %v4062_v17, 2  ;;  %v2981_v21 = vld [vmem:[%s4555_s8 + $0xb8] sm:$0xff] }
 0x33a   : > { %1485 = vmatprep.subr.bf16.mxu0 %v3473_v25  ;;  %v1906_v25 = vrot.slane %v1901_v24, %v871_v56 }
 0x33d   : > { %1486 = vmatpush1.bf16.msra.mxu0 %v3471_v27 }
 0x33e   : > { %1487 = vmatprep.subr.bf16.mxu0 %v3476_v28 }
 0x341   : > { %1488 = vmatpush1.bf16.msra.mxu0 %v3474_v29 }
 0x342   : > { %1489 = vmatprep.subr.bf16.mxu0 %v3479_v30 }
 0x345   : > { %1490 = vmatpush1.bf16.msra.mxu0 %v3477_v31 }
 0x346   : > { %1491 = vmatprep.subr.bf16.mxu0 %v3482_v32 }
 0x349   : > { %1492 = vmatpush1.bf16.msra.mxu0 %v3480_v34 }
 0x34a   : > { %2893 = vmatprep.subr.msk.bf16.mxu0 %vm1370_vm10, %v2892_v35 }
 0x34d   : > { %1494 = vmatpush1.bf16.msra.mxu0 %v1478_v38 }
 0x34e   : > { %1604 = vmatprep.subr.bf16.mxu0 %v3487_v39 }
 0x350   : > { %2894 = vmatmul.mubr.msk.bf16.vlgmr.msra.gmra.mrb[8].mxu0 %vm1366_vm11, %v4062_v17 }
 0x351   : > { %1605 = vmatpush1.bf16.msra.mxu0 %v3485_v40  ;;  %1636 = vmatprep.mubr.bf16.mxu0 %v3625_v2  ;;  %v2082_v40 = vld [vmem:[%s4555_s8 + $0x8] sm:$0xff] }
 0x352   : > { %1606 = vmatprep.subr.bf16.mxu0 %v3490_v41  ;;  %v2973_v41 = vld [vmem:[%s4554_s7 + $0x8] sm:$0x1f] }
 0x355   : > { %1607 = vmatpush1.bf16.msra.mxu0 %v3488_v42 }
 0x356   : > { %1608 = vmatprep.subr.bf16.mxu0 %v3493_v43  ;;  %v2083_v43 = vld [vmem:[%s4555_s8 + $0x10] sm:$0xff] }
 0x359   : > { %1609 = vmatpush1.bf16.msra.mxu0 %v3491_v44  ;;  %v2084_v44 = vld [vmem:[%s4555_s8 + $0x18] sm:$0xff] }
 0x35a   : > { %1610 = vmatprep.subr.bf16.mxu0 %v3496_v45  ;;  %v3269_v45 = vpack.c.bf16 %v2084_v44, %v2083_v43  ;;  %v3536_v44 = vld [vmem:[%s4556_s9] sm:$0xff]  }
 0x35d   : > { %1611 = vmatpush1.bf16.msra.mxu0 %v3494_v46  ;;  %v2085_v46 = vld [vmem:[%s4555_s8 + $0x20] sm:$0xff] }
 0x35e   : > { %1612 = vmatprep.subr.bf16.mxu0 %v3499_v47  ;;  %v2086_v47 = vld [vmem:[%s4555_s8 + $0x28] sm:$0xff] }
 0x35f   : > { %v3272_v48 = vpack.c.bf16 %v2086_v47, %v2085_v46  ;;  %v3538_v46 = vld [vmem:[%s4556_s9 + $0x8] sm:$0xff]   ;;  %v3540_v47 = vld [vmem:[%s4556_s9 + $0x10] sm:$0xff]  }
 0x361   : > { %1613 = vmatpush1.bf16.msra.mxu0 %v3497_v50  ;;  %v2087_v50 = vld [vmem:[%s4555_s8 + $0x30] sm:$0xff] }
 0x362   : > { %2918 = vmatprep.subr.msk.bf16.mxu0 %vm1370_vm10, %v2917_v51  ;;  %v2088_v51 = vld [vmem:[%s4555_s8 + $0x38] sm:$0xff] }
 0x363   : > { %v3275_v52 = vpack.c.bf16 %v2088_v51, %v2087_v50  ;;  %v3542_v50 = vld [vmem:[%s4556_s9 + $0x18] sm:$0xff]   ;;  %v3543_v51 = vld [vmem:[%s4556_s9 + $0x40] sm:$0xff]  }
 0x365   : > { %1615 = vmatpush1.bf16.msra.mxu0 %v1599_v53  ;;  %v2089_v53 = vld [vmem:[%s4555_s8 + $0x40] sm:$0xff] }
 0x366   : > { %1730 = vmatprep.subr.bf16.mxu0 %v3504_v54  ;;  %v2090_v54 = vld [vmem:[%s4555_s8 + $0x48] sm:$0xff] }
 0x368   : > { %2919 = vmatmul.mubr.msk.bf16.vlgmr.msra.gmra.mrb[8].mxu0 %vm1366_vm11, %v1539_v59  ;;  %v2091_v59 = vld [vmem:[%s4555_s8 + $0x50] sm:$0xff] }
 0x369   : > { %1731 = vmatpush1.bf16.msra.mxu0 %v3502_v57  ;;  %1762 = vmatprep.mubr.bf16.mxu0 %v3625_v2  ;;  %v3278_v57 = vpack.c.bf16 %v2090_v54, %v2089_v53  ;;  %v3545_v53 = vld [vmem:[%s4556_s9 + $0x48] sm:$0xff]  }
 0x36a   : > { %1732 = vmatprep.subr.bf16.mxu0 %v3507_v60  ;;  %v2092_v60 = vld [vmem:[%s4555_s8 + $0x58] sm:$0xff] }
 0x36d   : > { %1733 = vmatpush1.bf16.msra.mxu0 %v3505_v61  ;;  %v3281_v61 = vpack.c.bf16 %v2092_v60, %v2091_v59 }
 0x36e   : > { %1734 = vmatprep.subr.bf16.mxu0 %v3510_v62  ;;  %v2093_v62 = vld [vmem:[%s4555_s8 + $0x60] sm:$0xff] }
 0x371   : > { %1735 = vmatpush1.bf16.msra.mxu0 %v3508_v63  ;;  %v2094_v63 = vld [vmem:[%s4555_s8 + $0x68] sm:$0xff] }
 0x372   : > { %1736 = vmatprep.subr.bf16.mxu0 %v3513_v0  ;;  %v3284_v0 = vpack.c.bf16 %v2094_v63, %v2093_v62  ;;  %v3546_v62 = vld [vmem:[%s4556_s9 + $0x78] sm:$0xff]  }
 0x375   : > { %1737 = vmatpush1.bf16.msra.mxu0 %v3511_v1  ;;  %v2095_v1 = vld [vmem:[%s4555_s8 + $0x70] sm:$0xff] }
 0x376   : > { %1738 = vmatprep.subr.bf16.mxu0 %v3516_v3  ;;  %v2096_v3 = vld [vmem:[%s4555_s8 + $0x78] sm:$0xff] }
 0x377   : > { %v3287_v4 = vpack.c.bf16 %v2096_v3, %v2095_v1  ;;  %v3548_v3 = vld [vmem:[%s4556_s9 + $0x80] sm:$0xff]  }
 0x379   : > { %1739 = vmatpush1.bf16.msra.mxu0 %v3514_v5  ;;  %v2097_v5 = vld [vmem:[%s4555_s8 + $0x80] sm:$0xff] }
 0x37a   : > { %2943 = vmatprep.subr.msk.bf16.mxu0 %vm1370_vm10, %v2942_v6  ;;  %v2098_v6 = vld [vmem:[%s4555_s8 + $0x88] sm:$0xff] }
 0x37b   : > { %v3290_v7 = vpack.c.bf16 %v2098_v6, %v2097_v5  ;;  %v3550_v5 = vld [vmem:[%s4556_s9 + $0x88] sm:$0xff]   ;;  %v3551_v6 = vld [vmem:[%s4556_s9 + $0x60] sm:$0xff]  }
 0x37d   : > { %1741 = vmatpush1.bf16.msra.mxu0 %v1725_v8  ;;  %v2099_v8 = vld [vmem:[%s4555_s8 + $0x90] sm:$0xff] }
 0x37e   : > { %1854 = vmatprep.subr.bf16.mxu0 %v3521_v9  ;;  %v2100_v9 = vld [vmem:[%s4555_s8 + $0x98] sm:$0xff] }
 0x380   : > { %2944 = vmatmul.mubr.msk.bf16.vlgmr.msra.gmra.mrb[8].mxu0 %vm1366_vm11, %v1665_v26  ;;  %v1910_v26 = vrot.slane %v1901_v24, %v875_v58  ;;  %v2081_v58 = vld [vmem:[%s4555_s8] sm:$0xff]  ;;  %v2983_v24 = vld [vmem:[%s4555_s8 + $0xc8] sm:$0xff] }
 0x381   : > { %1855 = vmatpush1.bf16.msra.mxu0 %v3519_v10  ;;  %1886 = vmatprep.mubr.bf16.mxu0 %v3625_v2  ;;  %v3528_v2 = vld [vmem:[%s4552_s5 + $0x190] ss:$8 sps:$4 sm:$0xff]   ;;  %v3266_v42 = vpack.c.bf16 %v2082_v40, %v2081_v58  ;;  %v3293_v10 = vpack.c.bf16 %v2100_v9, %v2099_v8  ;;  %v2995_v58 = vld [vmem:[%s4555_s8 + $0x128] sm:$0xff] }
 0x382   : > { %1856 = vmatprep.subr.bf16.mxu0 %v3524_v11  ;;  %v3553_v8 = vld [vmem:[%s4556_s9 + $0x68] sm:$0xff]   ;;  %v3554_v9 = vld [vmem:[%s4556_s9 + $0x98] sm:$0xff]  }
 0x385   : > { %1857 = vmatpush1.bf16.msra.mxu0 %v3522_v12 }
 0x386   : > { %1858 = vmatprep.subr.bf16.mxu0 %v3527_v13  ;;  %v2978_v13 = vld [vmem:[%s4555_s8 + $0xa0] sm:$0xff] }
 0x389   : > { %1859 = vmatpush1.bf16.msra.mxu0 %v3525_v14  ;;  %v2979_v14 = vld [vmem:[%s4555_s8 + $0xa8] sm:$0xff] }
 0x38a   : > { %1860 = vmatprep.subr.bf16.mxu0 %v3530_v15 }
 0x38d   : > { %1861 = vmatpush1.bf16.msra.mxu0 %v3528_v2 }
 0x38e   : > { %1862 = vmatprep.subr.bf16.mxu0 %v3533_v16 }
 0x391   : > { %1863 = vmatpush1.bf16.msra.mxu0 %v3531_v19  ;;  %v3296_v19 = vpack.c.bf16 %v2979_v14, %v2978_v13  ;;  %v3557_v14 = vld [vmem:[%s4556_s9 + $0xa8] sm:$0xff]  }
 0x392   : > { %2968 = vmatprep.subr.msk.bf16.mxu0 %vm1370_vm10, %v2967_v20  ;;  %v2980_v20 = vld [vmem:[%s4555_s8 + $0xb0] sm:$0xff] }
 0x395   : > { %1865 = vmatpush1.bf16.msra.mxu0 %v1849_v22  ;;  %v3299_v22 = vpack.c.bf16 %v2981_v21, %v2980_v20 }
 0x396   : > { %3103 = vmatprep.subr.bf16.mxu0 %v3626_v49 }
 0x398   : > { %2969 = vmatmul.mubr.msk.bf16.vlgmr.msra.gmra.mrb[8].mxu0 %vm1366_vm11, %v1789_v23  ;;  %v2982_v23 = vld [vmem:[%s4555_s8 + $0xc0] sm:$0xff] }
 0x399   : > { %3113 = vmatprep.mubr.msk.bf16.mxu0 %vm3629_vm14, %v3626_v49 }
 0x46b   : > { %v1888_v27 = vpop.f32.mrb[8].mxu0 }
 0x46c   : > { %v1913_v28 = vadd.f32 %v1906_v25, %v1888_v27  ;;  %v1890_v29 = vpop.f32.mrb[9].mxu0  ;;  %v2985_v27 = vld [vmem:[%s4555_s8 + $0xd8] sm:$0xff] }
 0x46d   : > { %v1914_v30 = vadd.f32 %v1910_v26, %v1890_v29  ;;  %v1892_v31 = vpop.f32.mrb[10].mxu0  ;;  %v2986_v29 = vld [vmem:[%s4555_s8 + $0xe0] sm:$0xff] }
 0x46e   : > { %v1915_v17 = vadd.f32 %v1906_v25, %v1892_v31  ;;  %v1894_v32 = vpop.f32.mrb[11].mxu0  ;;  %v1917_v34 = vmax.f32 %v1913_v28, 0.0  ;;  %v3302_v25 = vpack.c.bf16 %v2983_v24, %v2982_v23 }
 0x46f   : > { %v1916_v33 = vadd.f32 %v1910_v26, %v1894_v32  ;;  %v1918_v37 = vmax.f32 %v1914_v30, 0.0  ;;  %v2984_v26 = vld [vmem:[%s4555_s8 + $0xd0] sm:$0xff]  ;;  %v2987_v30 = vld [vmem:[%s4555_s8 + $0xe8] sm:$0xff]  ;;  %v2989_v32 = vld [vmem:[%s4555_s8 + $0xf8] sm:$0xff] }
 0x470   : > { %v1919_v35 = vmax.f32 %v1915_v17, 0.0  ;;  %v3305_v28 = vpack.c.bf16 %v2985_v27, %v2984_v26  ;;  %v3308_v31 = vpack.c.bf16 %v2987_v30, %v2986_v29  ;;  %v2988_v17 = vld [vmem:[%s4555_s8 + $0xf0] sm:$0xff] }
 0x471   : > { %v1920_v38 = vmax.f32 %v1916_v33, 0.0  ;;  %v3311_v33 = vpack.c.bf16 %v2989_v32, %v2988_v17 }
 0x472   : > { %v3256_v39 = vpack.c.bf16 %v1919_v35, %v1917_v34  ;;  %v2990_v34 = vld [vmem:[%s4555_s8 + $0x100] sm:$0xff]  ;;  %v2991_v35 = vld [vmem:[%s4555_s8 + $0x108] sm:$0xff] }
 0x473   : > { %v3253_v56 = vpack.c.bf16 %v1920_v38, %v1918_v37  ;;  %v3314_v37 = vpack.c.bf16 %v2991_v35, %v2990_v34  ;;  %v2992_v38 = vld [vmem:[%s4555_s8 + $0x110] sm:$0xff] }
 0x475   : > { %3255 = vmatprep.subr.msk.bf16.mxu1 %vm3254_vm12, %v3253_v56 }
 0x476   : > { %3258 = vmatpush1.bf16.msk.msra.mxu1 %vm3254_vm12, %v3256_v39 }
 0x477   : > { %3261 = vmatprep.subr.msk.bf16.mxu1 %vm3254_vm12, %v3253_v56 }
 0x479   : > { %2972 = vmatmul.mubr.msk.f32.vlgmr.msra.gmra.mrb[20].mxu1 %vm1922_vm13, %v1921_v55  ;;  %v2994_v55 = vld [vmem:[%s4555_s8 + $0x120] sm:$0xff] }
 0x47a   : > { %3264 = vmatpush1.bf16.msk.msra.mxu1 %vm3254_vm12, %v3256_v39  ;;  %2072 = vmatprep.mubr.f32.mxu1 %v3626_v49  ;;  %v2993_v39 = vld [vmem:[%s4555_s8 + $0x118] sm:$0xff]  ;;  %v3320_v40 = vpack.c.bf16 %v2995_v58, %v2994_v55 }
 0x47b   : > { %3265 = vmatprep.subr.bf16.mxu1 %v3628_v36  ;;  %v3317_v56 = vpack.c.bf16 %v2993_v39, %v2992_v38  ;;  %v2696_v38 = vld [vmem:[%s4557_s10] sm:$0x1] }
 0x47d   : > { %2976 = vmatmul.mubr.msk.f32.vlgmr.msra.gmra.mrb[22].mxu1 %vm1922_vm13, %v2973_v41  ;;  %v2996_v41 = vld [vmem:[%s4555_s8 + $0x130] sm:$0xff] }
 0x47e   : > { %3267 = vmatpush1.bf16.msra.mxu1 %v3266_v42  ;;  %v2997_v42 = vld [vmem:[%s4555_s8 + $0x138] sm:$0xff] }
 0x47f   : > { %3268 = vmatprep.subr.bf16.mxu1 %v3628_v36  ;;  %v3323_v43 = vpack.c.bf16 %v2997_v42, %v2996_v41 }
 0x482   : > { %3270 = vmatpush1.bf16.msra.mxu1 %v3269_v45  ;;  %v3537_v45 = vld [vmem:[%s4556_s9 + $0x28] sm:$0xff]  }
 0x483   : > { %3271 = vmatprep.subr.bf16.mxu1 %v3628_v36  ;;  %3104 = vmatpush3.bf16.msra.mxu0 %v3537_v45 }
 0x484   : > { %3105 = vmatprep.subr.bf16.mxu0 %v3626_v49 }
 0x486   : > { %3273 = vmatpush1.bf16.msra.mxu1 %v3272_v48  ;;  %v3541_v48 = vld [vmem:[%s4556_s9 + $0x38] sm:$0xff]  }
 0x487   : > { %3274 = vmatprep.subr.bf16.mxu1 %v3628_v36 }
 0x48a   : > { %3276 = vmatpush1.bf16.msra.mxu1 %v3275_v52  ;;  %v3544_v52 = vld [vmem:[%s4556_s9 + $0x20] sm:$0xff]  }
 0x48b   : > { %3277 = vmatprep.subr.bf16.mxu1 %v3628_v36 }
 0x48e   : > { %3279 = vmatpush1.bf16.msra.mxu1 %v3278_v57 }
 0x48f   : > { %3280 = vmatprep.subr.bf16.mxu1 %v3628_v36 }
 0x492   : > { %3282 = vmatpush1.bf16.msra.mxu1 %v3281_v61 }
 0x493   : > { %3283 = vmatprep.subr.bf16.mxu1 %v3628_v36 }
 0x496   : > { %3285 = vmatpush1.bf16.msra.mxu1 %v3284_v0  ;;  %v3547_v0 = vld [vmem:[%s4556_s9 + $0x50] sm:$0xff]  }
 0x497   : > { %3286 = vmatprep.subr.bf16.mxu1 %v3628_v36 }
 0x49a   : > { %3288 = vmatpush1.bf16.msra.mxu1 %v3287_v4  ;;  %v3549_v4 = vld [vmem:[%s4556_s9 + $0x58] sm:$0xff]  }
 0x49b   : > { %3289 = vmatprep.subr.bf16.mxu1 %v3628_v36 }
 0x49e   : > { %3291 = vmatpush1.bf16.msra.mxu1 %v3290_v7  ;;  %v3552_v7 = vld [vmem:[%s4556_s9 + $0x90] sm:$0xff]  }
 0x49f   : > { %3292 = vmatprep.subr.bf16.mxu1 %v3628_v36 }
 0x4a2   : > { %3294 = vmatpush1.bf16.msra.mxu1 %v3293_v10  ;;  %v3555_v10 = vld [vmem:[%s4556_s9 + $0x70] sm:$0xff]  }
 0x4a3   : > { %3295 = vmatprep.subr.bf16.mxu1 %v3628_v36 }
 0x54c   : > { %v1998_v11 = vpop.f32.mrb[20].mxu1 }
 0x54d   : > { %v2000_v12 = vpop.f32.mrb[21].mxu1 }
 0x550   : > { %v2074_v15 = vpop.f32.mrb[22].mxu1 }
 0x551   : > { %v2079_v2 = vmax.f32 %v1998_v11, %v2074_v15  ;;  %v2076_v16 = vpop.f32.mrb[23].mxu1  ;;  %v3558_v15 = vld [vmem:[%s4556_s9 + $0xb0] sm:$0xff]  }
 0x552   : > { %v2080_v18 = vmax.f32 %v2000_v12, %v2076_v16  ;;  %v3556_v12 = vld [vmem:[%s4556_s9 + $0xa0] sm:$0xff]  }
 0x553   : > { %v3560_v16 = vld [vmem:[%s4556_s9 + $0xc0] sm:$0xff]  }
 0x554   : > { %2977 = vmatprep.mubr.msk.f32.mxu1 %vm436_vm1, %v2080_v18 }
 0x555   : > { %2169 = vmatmul.mubr.f32.vlgmr.msra.gmra.mrb[24].mxu1 %v2079_v2 }
 0x556   : > { %3297 = vmatpush1.bf16.msra.mxu1 %v3296_v19  ;;  %2998 = vmatprep.mubr.msk.f32.mxu1 %vm436_vm1, %v2080_v18 }
 0x557   : > { %3298 = vmatprep.subr.bf16.mxu1 %v3628_v36 }
 0x55a   : > { %3300 = vmatpush1.bf16.msra.mxu1 %v3299_v22 }
 0x55b   : > { %3301 = vmatprep.subr.bf16.mxu1 %v3628_v36 }
 0x55e   : > { %3303 = vmatpush1.bf16.msra.mxu1 %v3302_v25 }
 0x55f   : > { %3304 = vmatprep.subr.bf16.mxu1 %v3628_v36 }
 0x562   : > { %3306 = vmatpush1.bf16.msra.mxu1 %v3305_v28 }
 0x563   : > { %3307 = vmatprep.subr.bf16.mxu1 %v3628_v36 }
 0x566   : > { %3309 = vmatpush1.bf16.msra.mxu1 %v3308_v31 }
 0x567   : > { %3310 = vmatprep.subr.bf16.mxu1 %v3628_v36 }
 0x56a   : > { %3312 = vmatpush1.bf16.msra.mxu1 %v3311_v33 }
 0x56b   : > { %3313 = vmatprep.subr.bf16.mxu1 %v3628_v36 }
 0x56e   : > { %3315 = vmatpush1.bf16.msra.mxu1 %v3314_v37 }
 0x56f   : > { %3316 = vmatprep.subr.bf16.mxu1 %v3628_v36 }
 0x572   : > { %3318 = vmatpush1.bf16.msra.mxu1 %v3317_v56 }
 0x573   : > { %3319 = vmatprep.subr.bf16.mxu1 %v3628_v36 }
 0x576   : > { %3321 = vmatpush1.bf16.msra.mxu1 %v3320_v40 }
 0x577   : > { %3322 = vmatprep.subr.bf16.mxu1 %v3628_v36  ;;  %v3539_v36 = vld [vmem:[%s4556_s9 + $0x30] sm:$0xff]  }
 0x578   : > { %3106 = vmatpush3.bf16.msra.mxu0 %v3539_v36 }
 0x579   : > { %3107 = vmatprep.subr.bf16.mxu0 %v3626_v49 }
 0x57a   : > { %3324 = vmatpush1.bf16.msra.mxu1 %v3323_v43 }
 0x57b   : > { %3117 = vmatprep.subr.bf16.mxu1 %v3626_v49 }
 0x57c   : > { %3108 = vmatpush3.bf16.msra.mxu0 %v3541_v48 }
 0x57d   : > { %2260 = vmatmul.mubr.f32.vlgmr.msra.gmra.mrb[26].mxu1 %v2079_v2  ;;  %3109 = vmatprep.subr.bf16.mxu0 %v3626_v49  ;;  %v3559_v2 = vld [vmem:[%s4556_s9 + $0xb8] sm:$0xff]  }
 0x57e   : > { %3118 = vmatpush3.bf16.msra.mxu1 %v3536_v44  ;;  %3127 = vmatprep.mubr.msk.bf16.mxu1 %vm3629_vm14, %v3626_v49 }
 0x57f   : > { %3119 = vmatprep.subr.bf16.mxu1 %v3626_v49 }
 0x580   : > { %3110 = vmatpush3.bf16.msra.mxu0 %v3543_v51 }
 0x581   : > { %3111 = vmatprep.subr.bf16.mxu0 %v3626_v49 }
 0x582   : > { %3120 = vmatpush3.bf16.msra.mxu1 %v3538_v46 }
 0x583   : > { %3121 = vmatprep.subr.bf16.mxu1 %v3626_v49 }
 0x584   : > { %3112 = vmatpush3.bf16.msra.mxu0 %v3545_v53 }
 0x585   : > { %3131 = vmatprep.subr.bf16.mxu0 %v3626_v49 }
 0x586   : > { %3122 = vmatpush3.bf16.msra.mxu1 %v3540_v47 }
 0x587   : > { %3123 = vmatprep.subr.bf16.mxu1 %v3626_v49 }
 0x58a   : > { %3124 = vmatpush3.bf16.msra.mxu1 %v3542_v50 }
 0x58b   : > { %3125 = vmatprep.subr.bf16.mxu1 %v3626_v49 }
 0x58e   : > { %3126 = vmatpush3.bf16.msra.mxu1 %v3544_v52 }
 0x58f   : > { %3145 = vmatprep.subr.bf16.mxu1 %v3626_v49 }
 0x628   : > { %v2170_v54 = vpop.f32.mrb[24].mxu1 }
 0x629   : > { %v2172_v57 = vpop.f32.mrb[25].mxu1 }
 0x650   : > { %v2261_v59 = vpop.f32.mrb[26].mxu1 }
 0x651   : > { %v2265_v60 = vmax.f32 %v2170_v54, %v2261_v59  ;;  %v2263_v61 = vpop.f32.mrb[27].mxu1 }
 0x653   : > { %v2266_v63 = vpack.c.bf16 %v2265_v60, %v2265_v60 }
 0x655   : > { %v2289_v1 = vshrl.u32 %v2266_v63, 16  ;;  %3128 = vmatmul.mubr.msk.bf16.vlgmr.msra.gmra.mrb[28].mxu1 %vm2321_vm15, %v2266_v63  ;;  %v2449_v13 = vrot.slane %v2266_v63, 1  ;;  %v2621_v18 = vrot.slane %v2266_v63, 2 }
 0x656   : > { %3146 = vmatpush3.bf16.msra.mxu1 %v3546_v62  ;;  %3155 = vmatprep.mubr.msk.bf16.mxu1 %vm3629_vm14, %v3626_v49 }
 0x657   : > { %3114 = vmatmul.mubr.msk.bf16.vlgmr.msra.gmra.mrb[12].mxu0 %vm2321_vm15, %v2289_v1  ;;  %3147 = vmatprep.subr.bf16.mxu1 %v3626_v49  ;;  %v2535_v11 = vrot.slane %v2289_v1, 1 }
 0x658   : > { %3132 = vmatpush3.bf16.msra.mxu0 %v3547_v0  ;;  %3141 = vmatprep.mubr.msk.bf16.mxu0 %vm3629_vm14, %v3626_v49 }
 0x659   : > { %3133 = vmatprep.subr.bf16.mxu0 %v3626_v49 }
 0x65a   : > { %3148 = vmatpush3.bf16.msra.mxu1 %v3548_v3 }
 0x65b   : > { %3149 = vmatprep.subr.bf16.mxu1 %v3626_v49 }
 0x65c   : > { %3134 = vmatpush3.bf16.msra.mxu0 %v3549_v4 }
 0x65d   : > { %3135 = vmatprep.subr.bf16.mxu0 %v3626_v49 }
 0x65e   : > { %3150 = vmatpush3.bf16.msra.mxu1 %v3550_v5 }
 0x65f   : > { %3151 = vmatprep.subr.bf16.mxu1 %v3626_v49 }
 0x660   : > { %3136 = vmatpush3.bf16.msra.mxu0 %v3551_v6 }
 0x661   : > { %3137 = vmatprep.subr.bf16.mxu0 %v3626_v49 }
 0x662   : > { %3152 = vmatpush3.bf16.msra.mxu1 %v3552_v7 }
 0x663   : > { %3153 = vmatprep.subr.bf16.mxu1 %v3626_v49 }
 0x664   : > { %3138 = vmatpush3.bf16.msra.mxu0 %v3553_v8 }
 0x665   : > { %3139 = vmatprep.subr.bf16.mxu0 %v3626_v49 }
 0x666   : > { %3154 = vmatpush3.bf16.msra.mxu1 %v3554_v9 }
 0x668   : > { %3140 = vmatpush3.bf16.msra.mxu0 %v3555_v10 }
 0x669   : > { %3156 = vmatmul.mubr.msk.bf16.vlgmr.msra.gmra.mrb[32].mxu1 %vm2321_vm15, %v2535_v11  ;;  %3159 = vmatprep.subr.bf16.mxu0 %v3626_v49 }
 0x66b   : > { %3142 = vmatmul.mubr.msk.bf16.vlgmr.msra.gmra.mrb[16].mxu0 %vm2321_vm15, %v2449_v13 }
 0x66c   : > { %3160 = vmatpush3.bf16.msra.mxu0 %v3556_v12  ;;  %3169 = vmatprep.mubr.msk.bf16.mxu0 %vm3629_vm14, %v3626_v49 }
 0x66d   : > { %3161 = vmatprep.subr.bf16.mxu0 %v3626_v49 }
 0x670   : > { %3162 = vmatpush3.bf16.msra.mxu0 %v3557_v14 }
 0x671   : > { %3163 = vmatprep.subr.bf16.mxu0 %v3626_v49 }
 0x674   : > { %3164 = vmatpush3.bf16.msra.mxu0 %v3558_v15 }
 0x675   : > { %3165 = vmatprep.subr.bf16.mxu0 %v3626_v49 }
 0x678   : > { %3166 = vmatpush3.bf16.msra.mxu0 %v3559_v2 }
 0x679   : > { %3167 = vmatprep.subr.bf16.mxu0 %v3626_v49 }
 0x67c   : > { %3168 = vmatpush3.bf16.msra.mxu0 %v3560_v16 }
 0x67f   : > { %3170 = vmatmul.mubr.msk.bf16.vlgmr.msra.gmra.mrb[20].mxu0 %vm2321_vm15, %v2621_v18 }
 0x728   : > { %v2431_v19 = vpop.f32.mrb[28].mxu1 }
 0x729   : > { %v3129_v20 = vpop.f32.mrb[29].mxu1 }
 0x72a   : > { %v2359_v21 = vpop.f32.mrb[12].mxu0  ;;  %v2434_v22 = vpop.f32.mrb[30].mxu1 }
 0x72b   : > { %v2432_v23 = vadd.f32 %v2431_v19, %v2359_v21  ;;  %v3115_v24 = vpop.f32.mrb[13].mxu0  ;;  %v3130_v25 = vpop.f32.mrb[31].mxu1 }
 0x72c   : > { %v2362_v26 = vpop.f32.mrb[14].mxu0 }
 0x72d   : > { %v3116_v27 = vpop.f32.mrb[15].mxu0 }
 0x73c   : > { %v2603_v28 = vpop.f32.mrb[32].mxu1 }
 0x73d   : > { %v3157_v29 = vpop.f32.mrb[33].mxu1 }
 0x73e   : > { %v2517_v30 = vpop.f32.mrb[16].mxu0  ;;  %v2606_v31 = vpop.f32.mrb[34].mxu1 }
 0x73f   : > { %v2523_v49 = vadd.f32 %v2517_v30, %v2432_v23  ;;  %v3143_v17 = vpop.f32.mrb[17].mxu0  ;;  %v3158_v32 = vpop.f32.mrb[35].mxu1 }
 0x740   : > { %v2520_v33 = vpop.f32.mrb[18].mxu0 }
 0x741   : > { %v3144_v34 = vpop.f32.mrb[19].mxu0  ;;  %v2609_v35 = vadd.f32 %v2603_v28, %v2523_v49 }
 0x752   : > { %v2689_v37 = vpop.f32.mrb[20].mxu0 }
 0x753   : > { %v2695_v39 = vadd.f32 %v2689_v37, %v2609_v35  ;;  %v3171_v56 = vpop.f32.mrb[21].mxu0 }
 0x754   : > { %v2692_v55 = vpop.f32.mrb[22].mxu0 }
 0x755   : > { %v2697_v58 = vadd.f32 %v2696_v38, %v2695_v39  ;;  %v3172_v40 = vpop.f32.mrb[23].mxu0 }
 0x757   : > { %v2698_v41 = vmax.f32 %v2697_v58, 0.0 }
 0x759   : > { %2700 = vst.msk [vmem:[%s378_s25] sm:$0x1] %vm2699_vm0, %v2698_v41 }
 0x75a   : > { %3574 = shalt.err (!%p3571_p3)
}
 0x75b   : > { %s3575_s15 = scalar_lea.hbm %s4505_s13, 16  ;;  %s3579_s30 = scalar_lea.hbm %s4558_s11, 32 }
 0x75c   : > { %p3576_p4 = scmp.ne.s32.totalorder %s4505_s13, %s3575_s15  ;;  %p3580_p9 = scmp.lt.u32.totalorder %s4505_s13, %s4558_s11 }
 0x75d   : > { %p3581_p10 = scmp.lt.u32.totalorder %s3579_s30, %s3575_s15  ;;  %p3583_p12 = scmp.lt.u32.totalorder %s3575_s15, %s4505_s13 }
 0x75e   : > { %p3577_p7 = pnand %p3576_p4, %p3729_p5 }
 0x75f   : > { %p3582_p11 = por %p3581_p10, %p3580_p9 }
 0x760   : > { %p3578_p8 = pneg %p3577_p7 }
 0x761   : > { %p3584_p13 = por %p3583_p12, %p3582_p11 }
 0x763   : > { %p3585_p0 = pnand %p3584_p13, %p3578_p8 }
 0x765   : > { %3588 = shalt.err (!%p3585_p0)
}
 0x766   : > { %3377 = dma.vmem_to_hbm [thread:$0]  (%p3729_p5), %s4507_s29, 16, %s4505_s13, %s2702_s14  }
 0x767 PF: > { %p3383_p1 = scmp.ge.s32.totalorder %s3623_s20, 2  ;;  %s2726_s0 = sand.u32 1, %s3611_s17  }
 0x768   : > { %s2727_s16 = scalar_lea.sflag [#allocation3], %s2726_s0 }
 0x769   : > { %p3380_p2 = pnand %p3383_p1, %p3733_p6 }
 0x76b   : > { %3606 = dma.done.wait (!%p3380_p2), %s2727_s16, 16  }
 0x76c   : > { %3608 = vsyncadd (!%p3380_p2), %s2727_s16, 4294967280  ;;  %p21_p3 = scmp.ge.s32.totalorder %s3716_s23, 4   ;;  %s4563_s17 = smov %s3615_s18 }
 0x76d   : > { %s4564_s18 = smov %s3619_s19  ;;  %s4565_s19 = smov %s3727_s26 }
 0x76e   : > { %s4566_s20 = smov %s3716_s23  ;;  %23 = sbr.rel (!%p21_p3) target bundleno = 5 (0x5), region = 115 }
 0x775   :  { %2731 = vsyncpa [#allocation3], 1 }
 0x776   :  { %2733 = vsyncpa [#allocation3 + $0x1], 1 }

</bundles_post_ra>
